<compile_context>
chip_gen: v5e
topology: v5e:2x2
jax: 0.10.0
libtpu: 0.0.40
codegen_flags: <defaults>
</compile_context>

<pallas_src>
import functools

import jax
import jax.numpy as jnp
from jax.experimental import pallas as pl
from jax.experimental.pallas import tpu as pltpu


def _round_up(x: int, m: int) -> int:
    return (x + m - 1) // m * m


# --------------------------------------------------------------------------
# Kernel: fused fc1/fc_action (block-diagonal) + fc2 + fc3, weights carved
# from one resident VMEM slab with static, aligned slices.
# --------------------------------------------------------------------------
def value_dnn_kernel(p_ref, a_ref, w_ref, o_ref, *,
                     AW, A, H1, H2, r_wa, r_b1, r_w2, r_b2, r_w3, r_b3):
    hi = jax.lax.Precision.HIGHEST

    # --- layer 1: relu(fc1(price)) || relu(fc_action(action))  (implicit cat)
    # w_ref[0:AW, 0:2H1]      = [W1^T | 0   ]
    # w_ref[r_wa:+A, 0:2H1]   = [0    | Wa^T]
    # so the sum of the two dots lands x in cols [0,H1) and y in cols [H1,2H1).
    h1 = jnp.dot(p_ref[...], w_ref[0:AW, 0:2 * H1],
                 precision=hi, preferred_element_type=jnp.float32)
    h1 = h1 + jnp.dot(a_ref[...], w_ref[r_wa:r_wa + A, 0:2 * H1],
                      precision=hi, preferred_element_type=jnp.float32)
    h1 = jnp.maximum(h1 + w_ref[r_b1:r_b1 + 1, 0:2 * H1], 0.0)

    # --- layer 2: relu(fc2(cat(x, y)))
    h2 = jnp.dot(h1, w_ref[r_w2:r_w2 + 2 * H1, 0:H2],
                 precision=hi, preferred_element_type=jnp.float32)
    h2 = jnp.maximum(h2 + w_ref[r_b2:r_b2 + 1, 0:H2], 0.0)

    # --- layer 3: fc3 (N=1) as a VPU multiply + XLU lane reduce.
    w3 = w_ref[r_w3:r_w3 + 1, 0:H2]                       # (1, H2)
    b3 = w_ref[r_b3:r_b3 + 1, 0:1]                        # (1, 1)
    o_ref[...] = jnp.sum(h2 * w3, axis=-1, keepdims=True) + b3


# --------------------------------------------------------------------------
# Parameters: PyTorch-style init + one-time packing into a lane-dense slab.
# --------------------------------------------------------------------------
def init_params(key, asset_num, window_size, hidden1, hidden2):
    """Deterministic PyTorch-style (uniform +-1/sqrt(fan_in)) init."""
    def linear(k, fan_in, fan_out):
        kw, kb = jax.random.split(k)
        bound = 1.0 / jnp.sqrt(fan_in)
        w = jax.random.uniform(kw, (fan_out, fan_in), jnp.float32, -bound, bound)
        b = jax.random.uniform(kb, (fan_out,), jnp.float32, -bound, bound)
        return w, b

    k1, k2, k3, k4 = jax.random.split(key, 4)
    W1, b1 = linear(k1, asset_num * window_size, hidden1)   # fc1
    Wa, ba = linear(k2, asset_num, hidden1)                 # fc_action
    W2, b2 = linear(k3, hidden1 * 2, hidden2)               # fc2
    W3, b3 = linear(k4, hidden2, 1)                         # fc3
    return dict(W1=W1, b1=b1, Wa=Wa, ba=ba, W2=W2, b2=b2, W3=W3, b3=b3)


def pack_params(params, asset_num, window_size):
    """Pack every weight and bias into one (rows, lanes) f32 slab.

    Row layout (all section starts 8-aligned):
      [0, AW)         : W1^T in cols [0, H1)
      [r_wa, +A)      : Wa^T in cols [H1, 2H1)         (block-diagonal with W1)
      r_b1            : (b1 | ba) in cols [0, 2H1)
      [r_w2, +2H1)    : W2^T in cols [0, H2)
      r_b2            : b2 in cols [0, H2)
      r_w3            : W3 row in cols [0, H2)
      r_b3            : b3 at col 0
    """
    W1, b1 = params["W1"], params["b1"]
    Wa, ba = params["Wa"], params["ba"]
    W2, b2 = params["W2"], params["b2"]
    W3, b3 = params["W3"], params["b3"]

    AW = asset_num * window_size
    A = asset_num
    H1 = W1.shape[0]
    H2 = W2.shape[0]

    r_wa = _round_up(AW, 8)
    r_b1 = _round_up(r_wa + A, 8)
    r_w2 = _round_up(r_b1 + 1, 8)
    r_b2 = _round_up(r_w2 + 2 * H1, 8)
    r_w3 = _round_up(r_b2 + 1, 8)
    r_b3 = _round_up(r_w3 + 1, 8)
    n_rows = _round_up(r_b3 + 1, 8)
    cw = _round_up(max(2 * H1, H2, 1), 128)     # one lane tile wide (here 128)

    slab = jnp.zeros((n_rows, cw), jnp.float32)
    slab = slab.at[0:AW, 0:H1].set(W1.T)
    slab = slab.at[r_wa:r_wa + A, H1:2 * H1].set(Wa.T)
    slab = slab.at[r_b1, 0:H1].set(b1)
    slab = slab.at[r_b1, H1:2 * H1].set(ba)
    slab = slab.at[r_w2:r_w2 + 2 * H1, 0:H2].set(W2.T)
    slab = slab.at[r_b2, 0:H2].set(b2)
    slab = slab.at[r_w3, 0:H2].set(W3[0])
    slab = slab.at[r_b3, 0].set(b3[0])

    dims = dict(AW=AW, A=A, H1=H1, H2=H2,
                r_wa=r_wa, r_b1=r_b1, r_w2=r_w2, r_b2=r_b2,
                r_w3=r_w3, r_b3=r_b3)
    return slab, dims


# --------------------------------------------------------------------------
# Batch-tile selection: as large as the batch allows, but keep >= 2 grid
# steps whenever possible so both v7x TensorCores get work ("parallel" axis).
# --------------------------------------------------------------------------
def _pick_block_b(batch: int, requested: int) -> int:
    bb = max(128, min(_round_up(requested, 128), _round_up(max(batch, 1), 128)))
    if batch > 128 and _round_up(batch, bb) // bb < 2:
        bb = _round_up(-(-batch // 2), 128)
    return bb


# --------------------------------------------------------------------------
# Batched forward: row b == ValueDNN.forward(price[b], action[b]).
# --------------------------------------------------------------------------
def value_dnn_forward(price, action, slab, dims, *, block_b=512):
    """price: (B, asset_num, window_size) f32, action: (B, asset_num) f32
    -> (B, 1) f32."""
    B = price.shape[0]
    AW, A, H1, H2 = dims["AW"], dims["A"], dims["H1"], dims["H2"]

    p2 = price.reshape(B, AW).astype(jnp.float32)
    a2 = action.reshape(B, A).astype(jnp.float32)

    bb = _pick_block_b(B, block_b)
    b_pad = _round_up(B, bb)
    if b_pad != B:
        p2 = jnp.pad(p2, ((0, b_pad - B), (0, 0)))
        a2 = jnp.pad(a2, ((0, b_pad - B), (0, 0)))

    kernel = functools.partial(
        value_dnn_kernel,
        AW=AW, A=A, H1=H1, H2=H2,
        r_wa=dims["r_wa"], r_b1=dims["r_b1"], r_w2=dims["r_w2"],
        r_b2=dims["r_b2"], r_w3=dims["r_w3"], r_b3=dims["r_b3"])

    flops = 2 * b_pad * (AW * 2 * H1 + A * 2 * H1 + 2 * H1 * H2 + H2)
    bytes_accessed = 4 * (b_pad * (AW + A + 1) + slab.size)

    out = pl.pallas_call(
        kernel,
        out_shape=jax.ShapeDtypeStruct((b_pad, 1), jnp.float32),
        grid=(b_pad // bb,),
        in_specs=[
            # Inputs: last block dim == full array dim, so no 128-lane padding.
            pl.BlockSpec((bb, AW), lambda i: (i, 0)),       # price tile
            pl.BlockSpec((bb, A), lambda i: (i, 0)),        # action tile
            # Weight slab: full-array block, same index every step -> resident,
            # one DMA per core for the whole call.
            pl.BlockSpec(slab.shape, lambda i: (0, 0)),
        ],
        out_specs=pl.BlockSpec((bb, 1), lambda i: (i, 0)),  # narrow writeback
        compiler_params=pltpu.CompilerParams(
            dimension_semantics=("parallel",)),             # 2 TCs on v7x
        cost_estimate=pl.CostEstimate(
            flops=flops, transcendentals=0, bytes_accessed=bytes_accessed),
    )(p2, a2, slab)

    return out[:B]


# --------------------------------------------------------------------------
# Pure-JAX reference mirroring the PyTorch forward exactly (batched).
# --------------------------------------------------------------------------
def value_dnn_reference(price, action, params):
    hi = jax.lax.Precision.HIGHEST
    B = price.shape[0]
    p = price.reshape(B, -1)
    x = jax.nn.relu(jnp.dot(p, params["W1"].T, precision=hi) + params["b1"])
    y = jax.nn.relu(jnp.dot(action, params["Wa"].T, precision=hi) + params["ba"])
    z = jnp.concatenate((x, y), axis=1)
    z = jax.nn.relu(jnp.dot(z, params["W2"].T, precision=hi) + params["b2"])
    return jnp.dot(z, params["W3"].T, precision=hi) + params["b3"]   # (B, 1)


if __name__ == "__main__":
    # Small, module-consistent shapes: asset_num=4, window_size=8,
    # hidden_size1=32, hidden_size2=32; batch of 256 -> two 128-row grid steps.
    asset_num, window_size, hidden1, hidden2 = 4, 8, 32, 32
    batch = 256

    key = jax.random.PRNGKey(0)
    kp, ka, kparams = jax.random.split(key, 3)

    price = jax.random.normal(kp, (batch, asset_num, window_size), jnp.float32)
    action = jax.random.normal(ka, (batch, asset_num), jnp.float32)

    params = init_params(kparams, asset_num, window_size, hidden1, hidden2)
    slab, dims = pack_params(params, asset_num, window_size)   # one-time packing

    out = value_dnn_forward(price, action, slab, dims, block_b=512)
    out = jax.block_until_ready(out)

    ref = value_dnn_reference(price, action, params)
    assert out.shape == (batch, 1)
    err = float(jnp.abs(out - ref).max())
    assert jnp.allclose(out, ref, atol=1e-4, rtol=1e-4), err

    print("KERNEL_OK")
</pallas_src>

<mosaic_0001>
module attributes {stable_mosaic.version = 11 : i64} {
  func.func @value_dnn_kernel(%arg0: i32, %arg1: memref<128x32xf32, #tpu.memory_space<vmem>>, %arg2: memref<128x4xf32, #tpu.memory_space<vmem>>, %arg3: memref<136x128xf32, #tpu.memory_space<vmem>>, %arg4: memref<128x1xf32, #tpu.memory_space<vmem>>) attributes {dimension_semantics = [#tpu.dimension_semantics<parallel>], iteration_bounds = array<i64: 2>, scalar_prefetch = 0 : i64, scratch_operands = 0 : i64, tpu.core_type = #tpu.core_type<tc>, window_params = [{transform_indices = @transform_0, window_bounds = array<i64: 128, 32>}, {transform_indices = @transform_1, window_bounds = array<i64: 128, 4>}, {pipeline_mode = #tpu.pipeline_mode<synchronous>, transform_indices = @transform_2, window_bounds = array<i64: 136, 128>}, {transform_indices = @transform_3, window_bounds = array<i64: 128, 1>}]} {
    %c0 = arith.constant 0 : index
    %c0_0 = arith.constant 0 : index
    %0 = vector.load %arg1[%c0, %c0_0] : memref<128x32xf32, #tpu.memory_space<vmem>>, vector<128x32xf32>
    %c0_1 = arith.constant 0 : index
    %c0_2 = arith.constant 0 : index
    %1 = vector.load %arg3[%c0_1, %c0_2] : memref<136x128xf32, #tpu.memory_space<vmem>>, vector<32x64xf32>
    %cst = arith.constant dense<0.000000e+00> : vector<128x64xf32>
    %2 = tpu.matmul %0, %1, %cst {dimension_numbers = #tpu.dot_dimension_numbers<[1], [0], [0], [1], [0, 0, 1, 1], [], []>, precision = #tpu.contract_precision<fp32>} : vector<128x32xf32>, vector<32x64xf32>, vector<128x64xf32> -> vector<128x64xf32>
    %c0_3 = arith.constant 0 : index
    %c0_4 = arith.constant 0 : index
    %3 = vector.load %arg2[%c0_3, %c0_4] : memref<128x4xf32, #tpu.memory_space<vmem>>, vector<128x4xf32>
    %c32 = arith.constant 32 : index
    %c0_5 = arith.constant 0 : index
    %4 = vector.load %arg3[%c32, %c0_5] : memref<136x128xf32, #tpu.memory_space<vmem>>, vector<4x64xf32>
    %cst_6 = arith.constant dense<0.000000e+00> : vector<128x64xf32>
    %5 = tpu.matmul %3, %4, %cst_6 {dimension_numbers = #tpu.dot_dimension_numbers<[1], [0], [0], [1], [0, 0, 1, 1], [], []>, precision = #tpu.contract_precision<fp32>} : vector<128x4xf32>, vector<4x64xf32>, vector<128x64xf32> -> vector<128x64xf32>
    %6 = arith.addf %2, %5 : vector<128x64xf32>
    %c40 = arith.constant 40 : index
    %c0_7 = arith.constant 0 : index
    %7 = vector.load %arg3[%c40, %c0_7] : memref<136x128xf32, #tpu.memory_space<vmem>>, vector<1x64xf32>
    %8 = vector.broadcast %7 : vector<1x64xf32> to vector<128x64xf32>
    %9 = arith.addf %6, %8 : vector<128x64xf32>
    %cst_8 = arith.constant 0.000000e+00 : f32
    %10 = vector.broadcast %cst_8 : f32 to vector<128x64xf32>
    %11 = arith.maximumf %9, %10 : vector<128x64xf32>
    %c48 = arith.constant 48 : index
    %c0_9 = arith.constant 0 : index
    %12 = vector.load %arg3[%c48, %c0_9] : memref<136x128xf32, #tpu.memory_space<vmem>>, vector<64x32xf32>
    %cst_10 = arith.constant dense<0.000000e+00> : vector<128x32xf32>
    %13 = tpu.matmul %11, %12, %cst_10 {dimension_numbers = #tpu.dot_dimension_numbers<[1], [0], [0], [1], [0, 0, 1, 1], [], []>, precision = #tpu.contract_precision<fp32>} : vector<128x64xf32>, vector<64x32xf32>, vector<128x32xf32> -> vector<128x32xf32>
    %c112 = arith.constant 112 : index
    %c0_11 = arith.constant 0 : index
    %14 = vector.load %arg3[%c112, %c0_11] : memref<136x128xf32, #tpu.memory_space<vmem>>, vector<1x32xf32>
    %15 = vector.broadcast %14 : vector<1x32xf32> to vector<128x32xf32>
    %16 = arith.addf %13, %15 : vector<128x32xf32>
    %cst_12 = arith.constant 0.000000e+00 : f32
    %17 = vector.broadcast %cst_12 : f32 to vector<128x32xf32>
    %18 = arith.maximumf %16, %17 : vector<128x32xf32>
    %c120 = arith.constant 120 : index
    %c0_13 = arith.constant 0 : index
    %19 = vector.load %arg3[%c120, %c0_13] : memref<136x128xf32, #tpu.memory_space<vmem>>, vector<1x32xf32>
    %c128 = arith.constant 128 : index
    %c0_14 = arith.constant 0 : index
    %20 = vector.load %arg3[%c128, %c0_14] : memref<136x128xf32, #tpu.memory_space<vmem>>, vector<1x1xf32>
    %21 = vector.broadcast %19 : vector<1x32xf32> to vector<128x32xf32>
    %22 = arith.mulf %18, %21 : vector<128x32xf32>
    %cst_15 = arith.constant dense<0.000000e+00> : vector<128xf32>
    %23 = vector.multi_reduction <add>, %22, %cst_15 [1] : vector<128x32xf32> to vector<128xf32>
    %24 = vector.shape_cast %23 : vector<128xf32> to vector<128x1xf32>
    %25 = vector.broadcast %20 : vector<1x1xf32> to vector<128x1xf32>
    %26 = arith.addf %24, %25 : vector<128x1xf32>
    %c0_16 = arith.constant 0 : index
    %c0_17 = arith.constant 0 : index
    %27 = vector.load %arg4[%c0_16, %c0_17] : memref<128x1xf32, #tpu.memory_space<vmem>>, vector<128x1xf32>
    tpu.vector_store %arg4[%c0_16, %c0_17], %26 {strides = array<i32>} : memref<128x1xf32, #tpu.memory_space<vmem>>, vector<128x1xf32>,
    return
  }
  func.func @transform_0(%arg0: i32) -> (i32, i32) {
    %c0_i32 = arith.constant 0 : i32
    %c0_i32_0 = arith.constant 0 : i32
    return %arg0, %c0_i32 : i32, i32
  }
  func.func @transform_1(%arg0: i32) -> (i32, i32) {
    %c0_i32 = arith.constant 0 : i32
    %c0_i32_0 = arith.constant 0 : i32
    return %arg0, %c0_i32 : i32, i32
  }
  func.func @transform_2(%arg0: i32) -> (i32, i32) {
    %c0_i32 = arith.constant 0 : i32
    %c0_i32_0 = arith.constant 0 : i32
    %c0_i32_1 = arith.constant 0 : i32
    return %c0_i32, %c0_i32_0 : i32, i32
  }
  func.func @transform_3(%arg0: i32) -> (i32, i32) {
    %c0_i32 = arith.constant 0 : i32
    %c0_i32_0 = arith.constant 0 : i32
    return %arg0, %c0_i32 : i32, i32
  }
}

</mosaic_0001>

<bundles_post_ra>
// kernel: tpu_custom_call.1
= control target key start
LH: loop header
LB: loop body
LE: loop exit
PB: predicated region body
PF: predicated region fallthrough
CT: control target
= control target key end

     0   :  { %s2631_s12 = smov 0   ;;  %s3742_s0 = inlined_call_operand.vmem [shape: f32[256,32], index: 0, kind: input, shape index: {}]   ;;  %s3743_s1 = inlined_call_operand.vmem [shape: f32[256,4], index: 1, kind: input, shape index: {}]   ;;  %s3744_s2 = inlined_call_operand.vmem [shape: f32[136,128], index: 2, kind: input, shape index: {}]   ;;  %s3745_s3 = inlined_call_operand.vmem [shape: f32[256,1], index: 3, kind: output, shape index: {}]  }
   0x1 LB: > { %s2576_s13 = sadd.s32 4294967295, %s2609_s12   ;;  %p2580_p0 = scmp.ge.s32.totalorder %s2609_s12, 1  ;;  %s2609_s12 = sphi %s2631_s12, %s13_s12  }
   0x2   : > { %p149_p1 = scmp.lt.s32.totalorder %s2609_s12, 3 }
   0x4   : > { %p150_p2 = pnand %p2580_p0, %p149_p1 }
   0x6   : > { %153 = sbr.rel (%p150_p2) target bundleno = 1002 (0x3ea), region = 32 }
   0xb   : > { %v232_v0 = vld [vmem:[%s3744_s2 + $0x20] sm:$0xf]  ;;  %vm282_vm0 = vcmask 1043456   ;;  %s2581_s16 = sshll.u32 %s2576_s13, 4  ;;  %vm233_vm1 = vcmask 31744   ;;  %vm897_vm2 = vcmask 261120  }
   0xc   : > { %v284_v1 = vsel %vm282_vm0, %v232_v0, 0  ;;  %p179_p3 = scmp.lt.s32.totalorder %s2581_s16, 31  ;;  %vm1640_vm3 = vcmask 523264   ;;  %vm2491_vm4 = vcmask 7168  }
   0xd   : > { %v301_v2 = vand.u32 4294901760, %v284_v1 }
   0xe   : > { %s3777_s16 = smov (!%p179_p3, %s2581_s16), 31 }
   0xf   : > { %2589 = vmatpush.msra.mxu2 %v301_v2  ;;  %v448_v3 = vsub.f32 %v284_v1, %v301_v2  ;;  %302 = vmatpush.msra.mxu0 %v301_v2  ;;  %s2642_s17 = sshll.u32 %s3777_s16, 3 }
  0x10   : > { %s2648_s20 = scalar_lea.vmem %s3743_s1, %s2642_s17  ;;  %s2978_s4 = scalar_lea.vmem %s3742_s0, %s2642_s17 }
  0x11   : > { %v449_v4 = vand.u32 4294901760, %v448_v3  ;;  %535 = vmatpush.msrb.mxu2 %v448_v3  ;;  %v224_v5 = vld [vmem:[%s2648_s20 + $0x40] sm:$0xff]  ;;  %v225_v6 = vld [vmem:[%s2648_s20 + $0x48] sm:$0xff]  ;;  %v226_v12 = vld [vmem:[%s2648_s20 + $0x50] sm:$0xff]  ;;  %s3703_s6 = scalar_lea.vmem %s3745_s3, %s2642_s17 }
  0x12   : > { %v216_v7 = vld [vmem:[%s2648_s20] sm:$0xff]  ;;  %v259_v9 = vsel %vm233_vm1, %v224_v5, 0  ;;  %v262_v10 = vsel %vm233_vm1, %v225_v6, 0  ;;  %v217_v13 = vld [vmem:[%s2648_s20 + $0x8] sm:$0xff]  ;;  %v218_v17 = vld [vmem:[%s2648_s20 + $0x10] sm:$0xff]  ;;  %v265_v19 = vsel %vm233_vm1, %v226_v12, 0 }
  0x13   : > { %v450_v8 = vsub.f32 %v448_v3, %v449_v4  ;;  %v235_v11 = vsel %vm233_vm1, %v216_v7, 0  ;;  %749 = vmatpush.msrb.mxu0 %v449_v4  ;;  %v2658_v14 = vand.u32 4294901760, %v259_v9  ;;  %v2660_v15 = vand.u32 4294901760, %v262_v10  ;;  %v227_v35 = vld [vmem:[%s2648_s20 + $0x58] sm:$0xff]  ;;  %v228_v51 = vld [vmem:[%s2648_s20 + $0x60] sm:$0xff]  ;;  %v229_v1 = vld [vmem:[%s2648_s20 + $0x68] sm:$0xff] }
  0x14   : > { %v2662_v16 = vand.u32 4294901760, %v235_v11  ;;  %v238_v20 = vsel %vm233_vm1, %v217_v13, 0  ;;  %v241_v25 = vsel %vm233_vm1, %v218_v17, 0  ;;  %v2687_v30 = vand.u32 4294901760, %v265_v19  ;;  %v219_v38 = vld [vmem:[%s2648_s20 + $0x18] sm:$0xff]  ;;  %v220_v52 = vld [vmem:[%s2648_s20 + $0x20] sm:$0xff] }
  0x15   : > { %v451_v18 = vand.u32 4294901760, %v450_v8  ;;  %v2668_v21 = vsub.f32 %v259_v9, %v2658_v14  ;;  %v2671_v22 = vsub.f32 %v262_v10, %v2660_v15  ;;  %v2676_v24 = vand.u32 4294901760, %v238_v20 }
  0x16   : > { %v2674_v23 = vsub.f32 %v235_v11, %v2662_v16  ;;  %v2696_v34 = vand.u32 4294901760, %v241_v25  ;;  %v2701_v39 = vsub.f32 %v265_v19, %v2687_v30  ;;  %v268_v42 = vsel %vm233_vm1, %v227_v35, 0  ;;  %v222_v19 = vld [vmem:[%s2648_s20 + $0x30] sm:$0xff] }
  0x17   : > { %2590 = vmatpush.msra.mxu3 %v451_v18  ;;  %452 = vmatpush.msra.mxu1 %v451_v18  ;;  %v369_v26 = vand.u32 4294901760, %v2668_v21  ;;  %v2684_v28 = vsub.f32 %v238_v20, %v2676_v24  ;;  %v377_v29 = vand.u32 4294901760, %v2671_v22  ;;  %v244_v44 = vsel %vm233_vm1, %v219_v38, 0  ;;  %v230_v18 = vld [vmem:[%s2648_s20 + $0x70] sm:$0xff] }
  0x18   : > { %486 = vmatmul.f32.vlgmr.msra.gmra.mxu3 %v2658_v14  ;;  %v305_v27 = vand.u32 4294901760, %v2674_v23  ;;  %454 = vmatmul.f32.vlgmr.msra.gmra.mxu1 %v2662_v16  ;;  %v2711_v43 = vsub.f32 %v241_v25, %v2696_v34  ;;  %v385_v45 = vand.u32 4294901760, %v2701_v39  ;;  %v2717_v46 = vand.u32 4294901760, %v268_v42 }
  0x19   : > { %633 = vmatpush.msrb.mxu3 %v301_v2  ;;  %831 = vmatpush.msrb.mxu1 %v301_v2  ;;  %v370_v31 = vsub.f32 %v2668_v21, %v369_v26  ;;  %v313_v33 = vand.u32 4294901760, %v2684_v28  ;;  %v378_v40 = vsub.f32 %v2671_v22, %v377_v29  ;;  %v2720_v50 = vand.u32 4294901760, %v244_v44  ;;  %v221_v2 = vld [vmem:[%s2648_s20 + $0x28] sm:$0xff] }
  0x1a   : > { %v306_v32 = vsub.f32 %v2674_v23, %v305_v27  ;;  %v321_v49 = vand.u32 4294901760, %v2711_v43  ;;  %v2725_v53 = vsub.f32 %v268_v42, %v2717_v46  ;;  %v386_v54 = vsub.f32 %v2701_v39, %v385_v45 }
  0x1b   : > { %v371_v36 = vand.u32 4294901760, %v370_v31  ;;  %v314_v41 = vsub.f32 %v2684_v28, %v313_v33  ;;  %v379_v47 = vand.u32 4294901760, %v378_v40  ;;  %v271_v56 = vsel %vm233_vm1, %v228_v51, 0 }
  0x1c   : > { %v307_v37 = vand.u32 4294901760, %v306_v32  ;;  %v322_v55 = vsub.f32 %v2711_v43, %v321_v49  ;;  %v2735_v57 = vsub.f32 %v244_v44, %v2720_v50  ;;  %v247_v58 = vsel %vm233_vm1, %v220_v52, 0 }
  0x1d   : > { %372 = vmatmul.f32.vlgmr.msra.gmra.mxu2 %v371_v36  ;;  %v315_v48 = vand.u32 4294901760, %v314_v41  ;;  %v393_v59 = vand.u32 4294901760, %v2725_v53  ;;  %v2741_v60 = vand.u32 4294901760, %v271_v56  ;;  %v387_v61 = vand.u32 4294901760, %v386_v54 }
  0x1e   : > { %308 = vmatmul.f32.vlgmr.msra.gmra.mxu0 %v307_v37  ;;  %v323_v62 = vand.u32 4294901760, %v322_v55  ;;  %v329_v63 = vand.u32 4294901760, %v2735_v57  ;;  %v2744_v0 = vand.u32 4294901760, %v247_v58  ;;  %v274_v6 = vsel %vm233_vm1, %v229_v1, 0 }
  0x1f   : > { %v2749_v3 = vsub.f32 %v271_v56, %v2741_v60  ;;  %v394_v4 = vsub.f32 %v2725_v53, %v393_v59  ;;  %v250_v8 = vsel %vm233_vm1, %v221_v2, 0  ;;  %v2765_v10 = vand.u32 4294901760, %v274_v6  ;;  %v215_v56 = vld [vmem:[%s3744_s2 + $0x18] sm:$0xff] }
  0x20   : > { %490 = vmatmul.f32.gmra.mxu3 %v2660_v15  ;;  %458 = vmatmul.f32.gmra.mxu1 %v2676_v24  ;;  %v330_v5 = vsub.f32 %v2735_v57, %v329_v63  ;;  %v2759_v7 = vsub.f32 %v247_v58, %v2744_v0  ;;  %v2768_v17 = vand.u32 4294901760, %v250_v8  ;;  %v277_v32 = vsel %vm233_vm1, %v230_v18, 0 }
  0x21   : > { %v401_v9 = vand.u32 4294901760, %v2749_v3  ;;  %v395_v11 = vand.u32 4294901760, %v394_v4  ;;  %v2773_v20 = vsub.f32 %v274_v6, %v2765_v10  ;;  %v253_v36 = vsel %vm233_vm1, %v222_v19, 0 }
  0x22   : > { %v331_v12 = vand.u32 4294901760, %v330_v5  ;;  %v337_v13 = vand.u32 4294901760, %v2759_v7  ;;  %v2783_v35 = vsub.f32 %v250_v8, %v2768_v17  ;;  %v2789_v38 = vand.u32 4294901760, %v277_v32 }
  0x23   : > { %v402_v25 = vsub.f32 %v2749_v3, %v401_v9  ;;  %v409_v37 = vand.u32 4294901760, %v2773_v20  ;;  %v2792_v44 = vand.u32 4294901760, %v253_v36 }
  0x24   : > { %v338_v31 = vsub.f32 %v2759_v7, %v337_v13  ;;  %v345_v42 = vand.u32 4294901760, %v2783_v35  ;;  %v2800_v52 = vsub.f32 %v277_v32, %v2789_v38 }
  0x25   : > { %380 = vmatmul.f32.gmra.mxu2 %v379_v47  ;;  %v403_v40 = vand.u32 4294901760, %v402_v25  ;;  %v231_v47 = vld [vmem:[%s2648_s20 + $0x78] sm:$0xff]  ;;  %v410_v51 = vsub.f32 %v2773_v20, %v409_v37  ;;  %v2806_v55 = vsub.f32 %v253_v36, %v2792_v44 }
  0x26   : > { %316 = vmatmul.f32.gmra.mxu0 %v315_v48  ;;  %v339_v41 = vand.u32 4294901760, %v338_v31  ;;  %v223_v48 = vld [vmem:[%s2648_s20 + $0x38] sm:$0xff]  ;;  %v346_v54 = vsub.f32 %v2783_v35, %v345_v42  ;;  %v280_v58 = vsel %vm233_vm1, %v231_v47, 0  ;;  %v417_v2 = vand.u32 4294901760, %v2800_v52 }
  0x27   : > { %v411_v1 = vand.u32 4294901760, %v410_v51  ;;  %v2823_v6 = vand.u32 4294901760, %v280_v58  ;;  %v353_v8 = vand.u32 4294901760, %v2806_v55 }
  0x28   : > { %494 = vmatmul.f32.gmra.mxu3 %v2687_v30  ;;  %462 = vmatmul.f32.gmra.mxu1 %v2696_v34  ;;  %v347_v5 = vand.u32 4294901760, %v346_v54  ;;  %v418_v18 = vsub.f32 %v2800_v52, %v417_v2 }
  0x29   : > { %v2837_v25 = vsub.f32 %v280_v58, %v2823_v6  ;;  %v354_v31 = vsub.f32 %v2806_v55, %v353_v8 }
  0x2b   : > { %v355_v47 = vand.u32 4294901760, %v354_v31 }
  0x2d   : > { %388 = vmatmul.f32.gmra.mxu2 %v387_v61  ;;  %v2812_v61 = vand.u32 4294901760, %v215_v56 }
  0x2e   : > { %324 = vmatmul.f32.gmra.mxu0 %v323_v62  ;;  %v256_v62 = vsel %vm233_vm1, %v223_v48, 0 }
  0x2f   : > { %959 = vmatpush.msra.mxu2 %v2812_v61  ;;  %v2820_v4 = vsub.f32 %v215_v56, %v2812_v61  ;;  %1314 = vmatpush.msra.mxu1 %v2812_v61 }
  0x30   : > { %498 = vmatmul.f32.gmra.mxu3 %v2717_v46  ;;  %466 = vmatmul.f32.gmra.mxu1 %v2720_v50 }
  0x31   : > { %1210 = vmatpush.msra.mxu0 %v2820_v4 }
  0x35   : > { %396 = vmatmul.f32.gmra.mxu2 %v395_v11  ;;  %v2826_v11 = vand.u32 4294901760, %v256_v62 }
  0x36   : > { %332 = vmatmul.f32.gmra.mxu0 %v331_v12  ;;  %v1109_v12 = vand.u32 4294901760, %v2820_v4 }
  0x37   : > { %v2843_v32 = vsub.f32 %v256_v62, %v2826_v11  ;;  %v214_v62 = vld [vmem:[%s3744_s2 + $0x10] sm:$0xff] }
  0x38   : > { %502 = vmatmul.f32.gmra.mxu3 %v2741_v60  ;;  %470 = vmatmul.f32.gmra.mxu1 %v2744_v0  ;;  %v1110_v19 = vsub.f32 %v2820_v4, %v1109_v12 }
  0x39   : > { %v361_v48 = vand.u32 4294901760, %v2843_v32 }
  0x3a   : > { %v1111_v36 = vand.u32 4294901760, %v1110_v19 }
  0x3b   : > { %v362_v54 = vsub.f32 %v2843_v32, %v361_v48 }
  0x3c   : > { %1112 = vmatpush.msra.mxu3 %v1111_v36 }
  0x3d   : > { %404 = vmatmul.f32.gmra.mxu2 %v403_v40  ;;  %v419_v40 = vand.u32 4294901760, %v418_v18  ;;  %v363_v58 = vand.u32 4294901760, %v362_v54 }
  0x3e   : > { %340 = vmatmul.f32.gmra.mxu0 %v339_v41  ;;  %v425_v41 = vand.u32 4294901760, %v2837_v25 }
  0x40   : > { %506 = vmatmul.f32.gmra.mxu3 %v2765_v10  ;;  %474 = vmatmul.f32.gmra.mxu1 %v2768_v17  ;;  %v426_v51 = vsub.f32 %v2837_v25, %v425_v41 }
  0x42   : > { %v427_v56 = vand.u32 4294901760, %v426_v51 }
  0x45   : > { %412 = vmatmul.f32.gmra.mxu2 %v411_v1  ;;  %v2863_v1 = vand.u32 4294901760, %v214_v62 }
  0x46   : > { %348 = vmatmul.f32.gmra.mxu0 %v347_v5 }
  0x47   : > { %961 = vmatpush.msra.mxu2 %v2863_v1  ;;  %1316 = vmatpush.msra.mxu1 %v2863_v1 }
  0x48   : > { %510 = vmatmul.f32.gmra.mxu3 %v2789_v38  ;;  %478 = vmatmul.f32.gmra.mxu1 %v2792_v44 }
  0x4d   : > { %420 = vmatmul.f32.gmra.mxu2 %v419_v40 }
  0x4e   : > { %356 = vmatmul.f32.gmra.mxu0 %v355_v47 }
  0x50   : > { %514 = vmatmul.f32.gmra.mxu3 %v2823_v6  ;;  %482 = vmatmul.f32.gmra.mxu1 %v2826_v11 }
  0x55   : > { %428 = vmatmul.f32.gmra.mxu2 %v427_v56  ;;  %v197_v56 = vld [vmem:[%s2978_s4 + $0x8] sm:$0xff] }
  0x56   : > { %364 = vmatmul.f32.gmra.mxu0 %v363_v58 }
  0x58   : > { %637 = vmatmul.f32.vlgmr.msrb.gmra.mxu3 %v305_v27  ;;  %833 = vmatmul.f32.vlgmr.msrb.gmra.mxu1 %v2662_v16  ;;  %v2870_v27 = vsub.f32 %v214_v62, %v2863_v1 }
  0x5a   : > { %1213 = vmatpush.msra.mxu0 %v2870_v27 }
  0x5d   : > { %538 = vmatmul.f32.vlgmr.msrb.gmra.mxu2 %v2674_v23 }
  0x5e   : > { %751 = vmatmul.f32.vlgmr.msrb.gmra.mxu0 %v2662_v16  ;;  %v1115_v16 = vand.u32 4294901760, %v2870_v27 }
  0x60   : > { %643 = vmatmul.f32.gmra.mxu3 %v313_v33  ;;  %837 = vmatmul.f32.gmra.mxu1 %v2676_v24  ;;  %v1116_v23 = vsub.f32 %v2870_v27, %v1115_v16 }
  0x62   : > { %v1117_v33 = vand.u32 4294901760, %v1116_v23 }
  0x64   : > { %1118 = vmatpush.msra.mxu3 %v1117_v33 }
  0x65   : > { %543 = vmatmul.f32.gmra.mxu2 %v2684_v28 }
  0x66   : > { %755 = vmatmul.f32.gmra.mxu0 %v2676_v24  ;;  %v213_v24 = vld [vmem:[%s3744_s2 + $0x8] sm:$0xff] }
  0x67   : > { %v962_v28 = vand.u32 4294901760, %v213_v24 }
  0x68   : > { %649 = vmatmul.f32.gmra.mxu3 %v321_v49  ;;  %841 = vmatmul.f32.gmra.mxu1 %v2696_v34 }
  0x69   : > { %963 = vmatpush.msra.mxu2 %v962_v28  ;;  %1318 = vmatpush.msra.mxu1 %v962_v28 }
  0x6d   : > { %548 = vmatmul.f32.gmra.mxu2 %v2711_v43 }
  0x6e   : > { %759 = vmatmul.f32.gmra.mxu0 %v2696_v34  ;;  %v1120_v34 = vsub.f32 %v213_v24, %v962_v28 }
  0x70   : > { %655 = vmatmul.f32.gmra.mxu3 %v329_v63  ;;  %845 = vmatmul.f32.gmra.mxu1 %v2720_v50  ;;  %v1121_v43 = vand.u32 4294901760, %v1120_v34 }
  0x71   : > { %1216 = vmatpush.msra.mxu0 %v1120_v34 }
  0x72   : > { %v1122_v49 = vsub.f32 %v1120_v34, %v1121_v43 }
  0x75   : > { %553 = vmatmul.f32.gmra.mxu2 %v2735_v57 }
  0x76   : > { %763 = vmatmul.f32.gmra.mxu0 %v2720_v50  ;;  %v1123_v50 = vand.u32 4294901760, %v1122_v49 }
  0x78   : > { %661 = vmatmul.f32.gmra.mxu3 %v337_v13  ;;  %849 = vmatmul.f32.gmra.mxu1 %v2744_v0  ;;  %v212_v13 = vld [vmem:[%s3744_s2] sm:$0xff] }
  0x79   : > { %1124 = vmatpush.msra.mxu3 %v1123_v50 }
  0x7d   : > { %558 = vmatmul.f32.gmra.mxu2 %v2759_v7 }
  0x7e   : > { %767 = vmatmul.f32.gmra.mxu0 %v2744_v0 }
  0x80   : > { %667 = vmatmul.f32.gmra.mxu3 %v345_v42  ;;  %853 = vmatmul.f32.gmra.mxu1 %v2768_v17 }
  0x85   : > { %563 = vmatmul.f32.gmra.mxu2 %v2783_v35 }
  0x86   : > { %771 = vmatmul.f32.gmra.mxu0 %v2768_v17  ;;  %v964_v17 = vand.u32 4294901760, %v212_v13 }
  0x88   : > { %673 = vmatmul.f32.gmra.mxu3 %v353_v8  ;;  %857 = vmatmul.f32.gmra.mxu1 %v2792_v44  ;;  %v1126_v35 = vsub.f32 %v212_v13, %v964_v17  ;;  %v199_v13 = vld [vmem:[%s2978_s4 + $0x18] sm:$0xff] }
  0x89   : > { %965 = vmatpush.msra.mxu2 %v964_v17  ;;  %1320 = vmatpush.msra.mxu1 %v964_v17 }
  0x8a   : > { %1219 = vmatpush.msra.mxu0 %v1126_v35 }
  0x8b   : > { %1433 = vmatpush.msrb.mxu2 %v1109_v12 }
  0x8d   : > { %568 = vmatmul.f32.gmra.mxu2 %v2806_v55 }
  0x8e   : > { %775 = vmatmul.f32.gmra.mxu0 %v2792_v44  ;;  %v1127_v44 = vand.u32 4294901760, %v1126_v35  ;;  %1437 = vmatpush.msrb.mxu2 %v1115_v16 }
  0x90   : > { %679 = vmatmul.f32.gmra.mxu3 %v361_v48  ;;  %861 = vmatmul.f32.gmra.mxu1 %v2826_v11 }
  0x91   : > { %1441 = vmatpush.msrb.mxu2 %v1121_v43 }
  0x93   : > { %1445 = vmatpush.msrb.mxu2 %v1127_v44 }
  0x95   : > { %v2907_v57 = vpop.f32.mrf.mxu1  ;;  %573 = vmatmul.f32.gmra.mxu2 %v2843_v32 }
  0x96   : > { %779 = vmatmul.f32.gmra.mxu0 %v2826_v11 }
  0x98   : > { %685 = vmatmul.f32.gmra.mxu3 %v369_v26  ;;  %865 = vmatmul.f32.gmra.mxu1 %v2658_v14 }
  0x9b   : > { %v487_v63 = vpop.f32.mrf.mxu3  ;;  %v2914_v0 = vpop.f32.mrf.mxu0 }
  0x9d   : > { %v2916_v7 = vpop.f32.mrf.mxu1  ;;  %578 = vmatmul.f32.gmra.mxu2 %v2668_v21 }
  0x9e   : > { %783 = vmatmul.f32.gmra.mxu0 %v2658_v14 }
  0xa0   : > { %691 = vmatmul.f32.gmra.mxu3 %v377_v29  ;;  %869 = vmatmul.f32.gmra.mxu1 %v2660_v15  ;;  %v373_v26 = vpop.f32.mrf.mxu2  ;;  %v1128_v29 = vsub.f32 %v1126_v35, %v1127_v44  ;;  %v908_v35 = vsel %vm897_vm2, %v199_v13, 0 }
  0xa1   : > { %v2926_v42 = vadd.f32 %v487_v63, %v373_v26 }
  0xa2   : > { %v1129_v5 = vand.u32 4294901760, %v1128_v29 }
  0xa3   : > { %v491_v14 = vpop.f32.mrf.mxu3  ;;  %v2930_v21 = vpop.f32.mrf.mxu0 }
  0xa4   : > { %1130 = vmatpush.msra.mxu3 %v1129_v5 }
  0xa5   : > { %v2932_v55 = vpop.f32.mrf.mxu1  ;;  %583 = vmatmul.f32.gmra.mxu2 %v2671_v22 }
  0xa6   : > { %787 = vmatmul.f32.gmra.mxu0 %v2660_v15  ;;  %1524 = vmatpush.msrb.mxu3 %v2812_v61 }
  0xa8   : > { %697 = vmatmul.f32.gmra.mxu3 %v385_v45  ;;  %873 = vmatmul.f32.gmra.mxu1 %v2687_v30  ;;  %v381_v4 = vpop.f32.mrf.mxu2 }
  0xa9   : > { %v2939_v8 = vadd.f32 %v491_v14, %v381_v4  ;;  %1526 = vmatpush.msrb.mxu3 %v2863_v1 }
  0xab   : > { %v495_v11 = vpop.f32.mrf.mxu3  ;;  %v2942_v12 = vpop.f32.mrf.mxu0  ;;  %1528 = vmatpush.msrb.mxu3 %v962_v28 }
  0xad   : > { %v2945_v15 = vpop.f32.mrf.mxu1  ;;  %588 = vmatmul.f32.gmra.mxu2 %v2701_v39  ;;  %1530 = vmatpush.msrb.mxu3 %v964_v17 }
  0xae   : > { %791 = vmatmul.f32.gmra.mxu0 %v2687_v30 }
  0xb0   : > { %703 = vmatmul.f32.gmra.mxu3 %v393_v59  ;;  %877 = vmatmul.f32.gmra.mxu1 %v2717_v46  ;;  %v389_v22 = vpop.f32.mrf.mxu2 }
  0xb1   : > { %v2952_v45 = vadd.f32 %v495_v11, %v389_v22  ;;  %v3031_v11 = vand.u32 4294901760, %v908_v35 }
  0xb3   : > { %v499_v61 = vpop.f32.mrf.mxu3  ;;  %v2954_v18 = vpop.f32.mrf.mxu0 }
  0xb5   : > { %v2956_v19 = vpop.f32.mrf.mxu1  ;;  %593 = vmatmul.f32.gmra.mxu2 %v2725_v53 }
  0xb6   : > { %795 = vmatmul.f32.gmra.mxu0 %v2717_v46 }
  0xb8   : > { %709 = vmatmul.f32.gmra.mxu3 %v401_v9  ;;  %881 = vmatmul.f32.gmra.mxu1 %v2741_v60  ;;  %v397_v30 = vpop.f32.mrf.mxu2 }
  0xb9   : > { %v2963_v39 = vadd.f32 %v499_v61, %v397_v30  ;;  %v200_v61 = vld [vmem:[%s2978_s4 + $0x20] sm:$0xff]  ;;  %v460_v30 = vadd.f32 %v2916_v7, %v2930_v21 }
  0xbb   : > { %v503_v59 = vpop.f32.mrf.mxu3  ;;  %v2965_v31 = vpop.f32.mrf.mxu0 }
  0xbd   : > { %v2967_v32 = vpop.f32.mrf.mxu1  ;;  %598 = vmatmul.f32.gmra.mxu2 %v2749_v3  ;;  %v196_v3 = vld [vmem:[%s2978_s4] sm:$0xff] }
  0xbe   : > { %799 = vmatmul.f32.gmra.mxu0 %v2741_v60 }
  0xc0   : > { %715 = vmatmul.f32.gmra.mxu3 %v409_v37  ;;  %885 = vmatmul.f32.gmra.mxu1 %v2765_v10  ;;  %v405_v46 = vpop.f32.mrf.mxu2  ;;  %v899_v37 = vsel %vm897_vm2, %v196_v3, 0  ;;  %v911_v3 = vsel %vm897_vm2, %v200_v61, 0 }
  0xc1   : > { %v2980_v53 = vadd.f32 %v503_v59, %v405_v46  ;;  %v2995_v48 = vand.u32 4294901760, %v899_v37  ;;  %v3041_v7 = vand.u32 4294901760, %v911_v3 }
  0xc3   : > { %v507_v9 = vpop.f32.mrf.mxu3  ;;  %v2982_v36 = vpop.f32.mrf.mxu0 }
  0xc5   : > { %v2985_v60 = vpop.f32.mrf.mxu1  ;;  %603 = vmatmul.f32.gmra.mxu2 %v2773_v20 }
  0xc6   : > { %803 = vmatmul.f32.gmra.mxu0 %v2765_v10  ;;  %v967_v10 = vsub.f32 %v899_v37, %v2995_v48 }
  0xc8   : > { %721 = vmatmul.f32.gmra.mxu3 %v417_v2  ;;  %889 = vmatmul.f32.gmra.mxu1 %v2789_v38  ;;  %v413_v40 = vpop.f32.mrf.mxu2  ;;  %v902_v2 = vsel %vm897_vm2, %v197_v56, 0  ;;  %v968_v1 = vand.u32 4294901760, %v967_v10 }
  0xc9   : > { %v2993_v47 = vadd.f32 %v507_v9, %v413_v40  ;;  %v3011_v27 = vand.u32 4294901760, %v902_v2  ;;  %v991_v9 = vsub.f32 %v908_v35, %v3031_v11 }
  0xcb   : > { %v511_v51 = vpop.f32.mrf.mxu3  ;;  %v2997_v54 = vpop.f32.mrf.mxu0 }
  0xcd   : > { %v3000_v20 = vpop.f32.mrf.mxu1  ;;  %608 = vmatmul.f32.gmra.mxu2 %v2800_v52  ;;  %v198_v52 = vld [vmem:[%s2978_s4 + $0x10] sm:$0xff] }
  0xce   : > { %807 = vmatmul.f32.gmra.mxu0 %v2789_v38  ;;  %v969_v38 = vsub.f32 %v967_v10, %v968_v1  ;;  %v905_v24 = vsel %vm897_vm2, %v198_v52, 0  ;;  %v464_v52 = vadd.f32 %v2932_v55, %v2942_v12 }
  0xcf   : > { %v3023_v50 = vand.u32 4294901760, %v905_v24 }
  0xd0   : > { %727 = vmatmul.f32.gmra.mxu3 %v425_v41  ;;  %893 = vmatmul.f32.gmra.mxu1 %v2823_v6  ;;  %v421_v58 = vpop.f32.mrf.mxu2  ;;  %v975_v41 = vsub.f32 %v902_v2, %v3011_v27  ;;  %v970_v43 = vand.u32 4294901760, %v969_v38 }
  0xd1   : > { %v3009_v62 = vadd.f32 %v511_v51, %v421_v58  ;;  %v983_v26 = vsub.f32 %v905_v24, %v3023_v50 }
  0xd2   : > { %v976_v49 = vand.u32 4294901760, %v975_v41 }
  0xd3   : > { %v515_v16 = vpop.f32.mrf.mxu3  ;;  %v3013_v23 = vpop.f32.mrf.mxu0  ;;  %v984_v4 = vand.u32 4294901760, %v983_v26 }
  0xd4   : > { %v977_v17 = vsub.f32 %v975_v41, %v976_v49 }
  0xd5   : > { %613 = vmatmul.f32.gmra.mxu2 %v2837_v25  ;;  %v834_v33 = vpop.f32.mrf.mxu1  ;;  %v985_v46 = vsub.f32 %v983_v26, %v984_v4 }
  0xd6   : > { %811 = vmatmul.f32.gmra.mxu0 %v2823_v6  ;;  %v456_v6 = vadd.f32 %v2907_v57, %v2914_v0  ;;  %v978_v5 = vand.u32 4294901760, %v977_v17  ;;  %v202_v17 = vld [vmem:[%s2978_s4 + $0x30] sm:$0xff] }
  0xd7   : > { %v986_v56 = vand.u32 4294901760, %v985_v46  ;;  %v472_v46 = vadd.f32 %v2956_v19, %v2965_v31 }
  0xd8   : > { %1132 = vmatmul.f32.vlgmr.msra.gmra.mxu3 %v2995_v48  ;;  %1324 = vmatmul.f32.vlgmr.msra.gmra.mxu1 %v968_v1  ;;  %v429_v28 = vpop.f32.mrf.mxu2 }
  0xd9   : > { %v3021_v34 = vadd.f32 %v515_v16, %v429_v28  ;;  %v201_v16 = vld [vmem:[%s2978_s4 + $0x28] sm:$0xff] }
  0xda   : > { %v914_v24 = vsel %vm897_vm2, %v201_v16, 0 }
  0xdb   : > { %v638_v63 = vpop.f32.mrf.mxu3  ;;  %v752_v25 = vpop.f32.mrf.mxu0  ;;  %v3051_v13 = vand.u32 4294901760, %v914_v24 }
  0xdd   : > { %971 = vmatmul.f32.vlgmr.msra.gmra.mxu2 %v970_v43  ;;  %v838_v14 = vpop.f32.mrf.mxu1 }
  0xde   : > { %1222 = vmatmul.f32.vlgmr.msra.gmra.mxu0 %v967_v10  ;;  %v992_v10 = vand.u32 4294901760, %v991_v9 }
  0xe0   : > { %1136 = vmatmul.f32.gmra.mxu3 %v3011_v27  ;;  %1330 = vmatmul.f32.gmra.mxu1 %v976_v49  ;;  %v539_v44 = vpop.f32.mrf.mxu2 }
  0xe1   : > { %v540_v29 = vadd.f32 %v539_v44, %v456_v6 }
  0xe3   : > { %v644_v22 = vpop.f32.mrf.mxu3  ;;  %v756_v57 = vpop.f32.mrf.mxu0  ;;  %v639_v0 = vadd.f32 %v638_v63, %v540_v29  ;;  %v1007_v29 = vsub.f32 %v914_v24, %v3051_v13 }
  0xe5   : > { %v753_v59 = vadd.f32 %v752_v25, %v639_v0  ;;  %979 = vmatmul.f32.gmra.mxu2 %v978_v5  ;;  %v842_v2 = vpop.f32.mrf.mxu1  ;;  %v917_v5 = vsel %vm897_vm2, %v202_v17, 0  ;;  %v1008_v61 = vand.u32 4294901760, %v1007_v29 }
  0xe6   : > { %1227 = vmatmul.f32.gmra.mxu0 %v975_v41  ;;  %v993_v41 = vsub.f32 %v991_v9, %v992_v10 }
  0xe7   : > { %v3038_v37 = vadd.f32 %v834_v33, %v753_v59  ;;  %v999_v33 = vsub.f32 %v911_v3, %v3041_v7  ;;  %v203_v59 = vld [vmem:[%s2978_s4 + $0x38] sm:$0xff] }
  0xe8   : > { %1140 = vmatmul.f32.gmra.mxu3 %v3023_v50  ;;  %1336 = vmatmul.f32.gmra.mxu1 %v984_v4  ;;  %v544_v40 = vpop.f32.mrf.mxu2  ;;  %v994_v63 = vand.u32 4294901760, %v993_v41  ;;  %v476_v41 = vadd.f32 %v2967_v32, %v2982_v36 }
  0xe9   : > { %v545_v51 = vadd.f32 %v544_v40, %v460_v30  ;;  %v1000_v25 = vand.u32 4294901760, %v999_v33  ;;  %v1009_v40 = vsub.f32 %v1007_v29, %v1008_v61 }
  0xeb   : > { %v650_v21 = vpop.f32.mrf.mxu3  ;;  %v760_v58 = vpop.f32.mrf.mxu0  ;;  %v645_v1 = vadd.f32 %v644_v22, %v545_v51 }
  0xed   : > { %v757_v38 = vadd.f32 %v756_v57, %v645_v1  ;;  %987 = vmatmul.f32.gmra.mxu2 %v986_v56  ;;  %v846_v35 = vpop.f32.mrf.mxu1  ;;  %v1010_v1 = vand.u32 4294901760, %v1009_v40  ;;  %v206_v40 = vld [vmem:[%s2978_s4 + $0x50] sm:$0xff] }
  0xee   : > { %1232 = vmatmul.f32.gmra.mxu0 %v983_v26  ;;  %v468_v26 = vadd.f32 %v2945_v15, %v2954_v18  ;;  %v3061_v15 = vand.u32 4294901760, %v917_v5 }
  0xef   : > { %v3048_v28 = vadd.f32 %v838_v14, %v757_v38  ;;  %v1001_v14 = vsub.f32 %v999_v33, %v1000_v25  ;;  %v204_v38 = vld [vmem:[%s2978_s4 + $0x40] sm:$0xff] }
  0xf0   : > { %1144 = vmatmul.f32.gmra.mxu3 %v3031_v11  ;;  %1342 = vmatmul.f32.gmra.mxu1 %v992_v10  ;;  %v549_v43 = vpop.f32.mrf.mxu2  ;;  %v1015_v51 = vsub.f32 %v917_v5, %v3061_v15  ;;  %v920_v10 = vsel %vm897_vm2, %v203_v59, 0 }
  0xf1   : > { %v550_v49 = vadd.f32 %v549_v43, %v464_v52  ;;  %v1002_v0 = vand.u32 4294901760, %v1001_v14  ;;  %v3071_v31 = vand.u32 4294901760, %v920_v10  ;;  %v480_v14 = vadd.f32 %v2985_v60, %v2997_v54 }
  0xf2   : > { %v1016_v19 = vand.u32 4294901760, %v1015_v51 }
  0xf3   : > { %v656_v55 = vpop.f32.mrf.mxu3  ;;  %v764_v12 = vpop.f32.mrf.mxu0  ;;  %v651_v6 = vadd.f32 %v650_v21, %v550_v49  ;;  %v1023_v43 = vsub.f32 %v920_v10, %v3071_v31 }
  0xf4   : > { %v1017_v24 = vsub.f32 %v1015_v51, %v1016_v19 }
  0xf5   : > { %v761_v44 = vadd.f32 %v760_v58, %v651_v6  ;;  %995 = vmatmul.f32.gmra.mxu2 %v994_v63  ;;  %v850_v56 = vpop.f32.mrf.mxu1  ;;  %v923_v63 = vsel %vm897_vm2, %v204_v38, 0  ;;  %v1024_v32 = vand.u32 4294901760, %v1023_v43 }
  0xf6   : > { %1237 = vmatmul.f32.gmra.mxu0 %v991_v9  ;;  %v1018_v17 = vand.u32 4294901760, %v1017_v24  ;;  %v3081_v36 = vand.u32 4294901760, %v923_v63  ;;  %v207_v24 = vld [vmem:[%s2978_s4 + $0x58] sm:$0xff] }
  0xf7   : > { %v3058_v4 = vadd.f32 %v842_v2, %v761_v44  ;;  %v205_v44 = vld [vmem:[%s2978_s4 + $0x48] sm:$0xff]  ;;  %v1025_v5 = vsub.f32 %v1023_v43, %v1024_v32 }
  0xf8   : > { %1148 = vmatmul.f32.gmra.mxu3 %v3041_v7  ;;  %1348 = vmatmul.f32.gmra.mxu1 %v1000_v25  ;;  %v554_v22 = vpop.f32.mrf.mxu2 }
  0xf9   : > { %v555_v57 = vadd.f32 %v554_v22, %v468_v26  ;;  %v1031_v22 = vsub.f32 %v923_v63, %v3081_v36  ;;  %v1026_v59 = vand.u32 4294901760, %v1025_v5  ;;  %v208_v5 = vld [vmem:[%s2978_s4 + $0x60] sm:$0xff] }
  0xfb   : > { %v662_v18 = vpop.f32.mrf.mxu3  ;;  %v657_v30 = vadd.f32 %v656_v55, %v555_v57  ;;  %v768_v9 = vpop.f32.mrf.mxu0  ;;  %v926_v57 = vsel %vm897_vm2, %v205_v44, 0 }
  0xfc   : > { %v3091_v60 = vand.u32 4294901760, %v926_v57 }
  0xfd   : > { %v765_v3 = vadd.f32 %v764_v12, %v657_v30  ;;  %1003 = vmatmul.f32.gmra.mxu2 %v1002_v0  ;;  %v854_v12 = vpop.f32.mrf.mxu1 }
  0xfe   : > { %1242 = vmatmul.f32.gmra.mxu0 %v999_v33 }
  0xff   : > { %v3068_v2 = vadd.f32 %v846_v35, %v765_v3 }
 0x100   : > { %1152 = vmatmul.f32.gmra.mxu3 %v3051_v13  ;;  %1354 = vmatmul.f32.gmra.mxu1 %v1008_v61  ;;  %v559_v21 = vpop.f32.mrf.mxu2 }
 0x101   : > { %v560_v58 = vadd.f32 %v559_v21, %v472_v46  ;;  %v1032_v46 = vand.u32 4294901760, %v1031_v22  ;;  %v1039_v21 = vsub.f32 %v926_v57, %v3091_v60 }
 0x103   : > { %v668_v16 = vpop.f32.mrf.mxu3  ;;  %v663_v52 = vadd.f32 %v662_v18, %v560_v58  ;;  %v772_v49 = vpop.f32.mrf.mxu0  ;;  %v1033_v10 = vsub.f32 %v1031_v22, %v1032_v46  ;;  %v929_v58 = vsel %vm897_vm2, %v206_v40, 0  ;;  %v1040_v38 = vand.u32 4294901760, %v1039_v21 }
 0x105   : > { %v769_v33 = vadd.f32 %v768_v9, %v663_v52  ;;  %1011 = vmatmul.f32.gmra.mxu2 %v1010_v1  ;;  %v858_v54 = vpop.f32.mrf.mxu1  ;;  %v1034_v52 = vand.u32 4294901760, %v1033_v10  ;;  %v1041_v63 = vsub.f32 %v1039_v21, %v1040_v38 }
 0x106   : > { %1247 = vmatmul.f32.gmra.mxu0 %v1007_v29 }
 0x107   : > { %v3078_v25 = vadd.f32 %v850_v56, %v769_v33 }
 0x108   : > { %1156 = vmatmul.f32.gmra.mxu3 %v3061_v15  ;;  %1360 = vmatmul.f32.gmra.mxu1 %v1016_v19  ;;  %v564_v55 = vpop.f32.mrf.mxu2 }
 0x109   : > { %v565_v6 = vadd.f32 %v564_v55, %v476_v41  ;;  %v3101_v41 = vand.u32 4294901760, %v929_v58 }
 0x10b   : > { %v674_v26 = vpop.f32.mrf.mxu3  ;;  %v669_v35 = vadd.f32 %v668_v16, %v565_v6  ;;  %v776_v18 = vpop.f32.mrf.mxu0  ;;  %v1047_v55 = vsub.f32 %v929_v58, %v3101_v41 }
 0x10d   : > { %v773_v29 = vadd.f32 %v772_v49, %v669_v35  ;;  %1019 = vmatmul.f32.gmra.mxu2 %v1018_v17  ;;  %v1048_v35 = vand.u32 4294901760, %v1047_v55 }
 0x10e   : > { %1252 = vmatmul.f32.gmra.mxu0 %v1015_v51  ;;  %v484_v51 = vadd.f32 %v3000_v20, %v3013_v23 }
 0x10f   : > { %v3088_v0 = vadd.f32 %v854_v12, %v773_v29  ;;  %v932_v12 = vsel %vm897_vm2, %v207_v24, 0 }
 0x110   : > { %1160 = vmatmul.f32.gmra.mxu3 %v3071_v31  ;;  %1366 = vmatmul.f32.gmra.mxu1 %v1024_v32  ;;  %v569_v61 = vpop.f32.mrf.mxu2  ;;  %v3110_v44 = vand.u32 4294901760, %v932_v12 }
 0x111   : > { %v570_v30 = vadd.f32 %v569_v61, %v480_v14  ;;  %v935_v61 = vsel %vm897_vm2, %v208_v5, 0 }
 0x112   : > { %v1055_v57 = vsub.f32 %v932_v12, %v3110_v44 }
 0x113   : > { %v680_v9 = vpop.f32.mrf.mxu3  ;;  %v675_v3 = vadd.f32 %v674_v26, %v570_v30  ;;  %v780_v20 = vpop.f32.mrf.mxu0  ;;  %v1042_v26 = vand.u32 4294901760, %v1041_v63 }
 0x115   : > { %v777_v56 = vadd.f32 %v776_v18, %v675_v3  ;;  %1027 = vmatmul.f32.gmra.mxu2 %v1026_v59  ;;  %v1056_v59 = vand.u32 4294901760, %v1055_v57  ;;  %v209_v3 = vld [vmem:[%s2978_s4 + $0x68] sm:$0xff] }
 0x116   : > { %1257 = vmatmul.f32.gmra.mxu0 %v1023_v43  ;;  %v862_v43 = vpop.f32.mrf.mxu1 }
 0x117   : > { %v3098_v1 = vadd.f32 %v858_v54, %v777_v56  ;;  %v1057_v40 = vsub.f32 %v1055_v57, %v1056_v59  ;;  %v938_v56 = vsel %vm897_vm2, %v209_v3, 0 }
 0x118   : > { %1164 = vmatmul.f32.gmra.mxu3 %v3081_v36  ;;  %1372 = vmatmul.f32.gmra.mxu1 %v1032_v46  ;;  %v574_v19 = vpop.f32.mrf.mxu2  ;;  %v3119_v46 = vand.u32 4294901760, %v935_v61 }
 0x119   : > { %v575_v16 = vadd.f32 %v574_v19, %v484_v51  ;;  %v3128_v19 = vand.u32 4294901760, %v938_v56 }
 0x11a   : > { %v1063_v51 = vsub.f32 %v935_v61, %v3119_v46 }
 0x11b   : > { %v686_v23 = vpop.f32.mrf.mxu3  ;;  %v681_v33 = vadd.f32 %v680_v9, %v575_v16 }
 0x11c   : > { %v1064_v58 = vand.u32 4294901760, %v1063_v51 }
 0x11d   : > { %v781_v49 = vadd.f32 %v780_v20, %v681_v33  ;;  %1035 = vmatmul.f32.gmra.mxu2 %v1034_v52 }
 0x11e   : > { %1262 = vmatmul.f32.gmra.mxu0 %v1031_v22  ;;  %v1049_v22 = vsub.f32 %v1047_v55, %v1048_v35  ;;  %v1065_v20 = vsub.f32 %v1063_v51, %v1064_v58 }
 0x11f   : > { %v3106_v6 = vadd.f32 %v862_v43, %v781_v49 }
 0x120   : > { %1168 = vmatmul.f32.gmra.mxu3 %v3091_v60  ;;  %1378 = vmatmul.f32.gmra.mxu1 %v1040_v38  ;;  %v579_v17 = vpop.f32.mrf.mxu2  ;;  %v1050_v30 = vand.u32 4294901760, %v1049_v22  ;;  %v210_v38 = vld [vmem:[%s2978_s4 + $0x70] sm:$0xff]  ;;  %v1066_v43 = vand.u32 4294901760, %v1065_v20 }
 0x121   : > { %v580_v32 = vadd.f32 %v579_v17, %v2926_v42  ;;  %v941_v33 = vsel %vm897_vm2, %v210_v38, 0  ;;  %v211_v17 = vld [vmem:[%s2978_s4 + $0x78] sm:$0xff] }
 0x122   : > { %v3137_v63 = vand.u32 4294901760, %v941_v33 }
 0x123   : > { %v692_v14 = vpop.f32.mrf.mxu3  ;;  %v3112_v29 = vadd.f32 %v686_v23, %v580_v32  ;;  %v1071_v23 = vsub.f32 %v938_v56, %v3128_v19 }
 0x125   : > { %1043 = vmatmul.f32.gmra.mxu2 %v1042_v26  ;;  %v1072_v49 = vand.u32 4294901760, %v1071_v23  ;;  %v1079_v26 = vsub.f32 %v941_v33, %v3137_v63 }
 0x126   : > { %1267 = vmatmul.f32.gmra.mxu0 %v1039_v21  ;;  %v1058_v21 = vand.u32 4294901760, %v1057_v40 }
 0x127   : > { %v1073_v32 = vsub.f32 %v1071_v23, %v1072_v49  ;;  %v1080_v22 = vand.u32 4294901760, %v1079_v26 }
 0x128   : > { %1172 = vmatmul.f32.gmra.mxu3 %v3101_v41  ;;  %1384 = vmatmul.f32.gmra.mxu1 %v1048_v35  ;;  %v584_v42 = vpop.f32.mrf.mxu2  ;;  %v944_v35 = vsel %vm897_vm2, %v211_v17, 0 }
 0x129   : > { %v585_v18 = vadd.f32 %v584_v42, %v2939_v8  ;;  %v1074_v5 = vand.u32 4294901760, %v1073_v32 }
 0x12b   : > { %v698_v54 = vpop.f32.mrf.mxu3  ;;  %v3121_v9 = vadd.f32 %v692_v14, %v585_v18  ;;  %v1081_v18 = vsub.f32 %v1079_v26, %v1080_v22 }
 0x12d   : > { %1051 = vmatmul.f32.gmra.mxu2 %v1050_v30  ;;  %v1082_v3 = vand.u32 4294901760, %v1081_v18  ;;  %v3206_v18 = vpop.f32.mrf.mxu1 }
 0x12e   : > { %1272 = vmatmul.f32.gmra.mxu0 %v1047_v55 }
 0x130   : > { %1176 = vmatmul.f32.gmra.mxu3 %v3110_v44  ;;  %1390 = vmatmul.f32.gmra.mxu1 %v1056_v59  ;;  %v589_v8 = vpop.f32.mrf.mxu2 }
 0x131   : > { %v590_v10 = vadd.f32 %v589_v8, %v2952_v45 }
 0x133   : > { %v704_v16 = vpop.f32.mrf.mxu3  ;;  %v3130_v52 = vadd.f32 %v698_v54, %v590_v10 }
 0x135   : > { %1059 = vmatmul.f32.gmra.mxu2 %v1058_v21 }
 0x136   : > { %1277 = vmatmul.f32.gmra.mxu0 %v1055_v57  ;;  %v3146_v57 = vand.u32 4294901760, %v944_v35 }
 0x138   : > { %1180 = vmatmul.f32.gmra.mxu3 %v3119_v46  ;;  %1396 = vmatmul.f32.gmra.mxu1 %v1064_v58  ;;  %v594_v45 = vpop.f32.mrf.mxu2  ;;  %v1087_v30 = vsub.f32 %v944_v35, %v3146_v57 }
 0x139   : > { %v595_v24 = vadd.f32 %v594_v45, %v2963_v39 }
 0x13b   : > { %v710_v55 = vpop.f32.mrf.mxu3  ;;  %v3139_v12 = vadd.f32 %v704_v16, %v595_v24 }
 0x13d   : > { %1067 = vmatmul.f32.gmra.mxu2 %v1066_v43 }
 0x13e   : > { %1282 = vmatmul.f32.gmra.mxu0 %v1063_v51 }
 0x140   : > { %1184 = vmatmul.f32.gmra.mxu3 %v3128_v19  ;;  %1402 = vmatmul.f32.gmra.mxu1 %v1072_v49  ;;  %v599_v14 = vpop.f32.mrf.mxu2 }
 0x141   : > { %v600_v39 = vadd.f32 %v599_v14, %v2980_v53  ;;  %v1088_v53 = vand.u32 4294901760, %v1087_v30 }
 0x143   : > { %v716_v61 = vpop.f32.mrf.mxu3  ;;  %v3148_v42 = vadd.f32 %v710_v55, %v600_v39  ;;  %v1089_v56 = vsub.f32 %v1087_v30, %v1088_v53  ;;  %v3196_v39 = vpop.f32.mrf.mxu0 }
 0x145   : > { %1075 = vmatmul.f32.gmra.mxu2 %v1074_v5  ;;  %v1090_v21 = vand.u32 4294901760, %v1089_v56  ;;  %v3221_v56 = vpop.f32.mrf.mxu1 }
 0x146   : > { %1287 = vmatmul.f32.gmra.mxu0 %v1071_v23 }
 0x148   : > { %1188 = vmatmul.f32.gmra.mxu3 %v3137_v63  ;;  %1408 = vmatmul.f32.gmra.mxu1 %v1080_v22  ;;  %v604_v59 = vpop.f32.mrf.mxu2 }
 0x149   : > { %v605_v54 = vadd.f32 %v604_v59, %v2993_v47  ;;  %v1637_v47 = vld [vmem:[%s3744_s2 + $0x68] sm:$0xff] }
 0x14a   : > { %v3162_v38 = vand.u32 4294901760, %v1637_v47 }
 0x14b   : > { %v722_v40 = vpop.f32.mrf.mxu3  ;;  %v3153_v51 = vadd.f32 %v716_v61, %v605_v54 }
 0x14c   : > { %1698 = vmatpush.msrb.mxu0 %v3162_v38  ;;  %v3167_v23 = vsub.f32 %v1637_v47, %v3162_v38  ;;  %2085 = vmatpush.msra.mxu3 %v3162_v38 }
 0x14d   : > { %1083 = vmatmul.f32.gmra.mxu2 %v1082_v3 }
 0x14e   : > { %1292 = vmatmul.f32.gmra.mxu0 %v1079_v26  ;;  %v3750_v45 = vand.u32 4294901760, %v3167_v23  ;;  %1973 = vmatpush.msra.mxu2 %v3167_v23  ;;  %v1636_v26 = vld [vmem:[%s3744_s2 + $0x60] sm:$0xff] }
 0x14f   : > { %v3187_v35 = vand.u32 4294901760, %v1636_v26 }
 0x150   : > { %1192 = vmatmul.f32.gmra.mxu3 %v3146_v57  ;;  %1414 = vmatmul.f32.gmra.mxu1 %v1088_v53  ;;  %v609_v8 = vpop.f32.mrf.mxu2  ;;  %v1853_v43 = vsub.f32 %v3167_v23, %v3750_v45  ;;  %v3212_v53 = vpop.f32.mrf.mxu0 }
 0x151   : > { %v610_v10 = vadd.f32 %v609_v8, %v3009_v62  ;;  %1700 = vmatpush.msrb.mxu0 %v3187_v35  ;;  %v3192_v14 = vsub.f32 %v1636_v26, %v3187_v35  ;;  %2087 = vmatpush.msra.mxu3 %v3187_v35 }
 0x152   : > { %v1854_v49 = vand.u32 4294901760, %v1853_v43  ;;  %v3241_v43 = vpop.f32.mrf.mxu1 }
 0x153   : > { %v728_v58 = vpop.f32.mrf.mxu3  ;;  %v3157_v16 = vadd.f32 %v722_v40, %v610_v10  ;;  %v3749_v5 = vand.u32 4294901760, %v3192_v14  ;;  %1976 = vmatpush.msra.mxu2 %v3192_v14 }
 0x154   : > { %1855 = vmatpush.msrb.mxu1 %v1854_v49 }
 0x155   : > { %3751 = vst [vmem:[#allocation2_spill] sm:$0xff] %v3157_v16  ;;  %1091 = vmatmul.f32.gmra.mxu2 %v1090_v21  ;;  %v1859_v61 = vsub.f32 %v3192_v14, %v3749_v5 }
 0x156   : > { %1297 = vmatmul.f32.gmra.mxu0 %v1087_v30 }
 0x157   : > { %v1860_v30 = vand.u32 4294901760, %v1859_v61 }
 0x158   : > { %1532 = vmatmul.f32.vlgmr.msrb.gmra.mxu3 %v2995_v48  ;;  %v614_v20 = vpop.f32.mrf.mxu2 }
 0x159   : > { %v615_v62 = vadd.f32 %v614_v20, %v3021_v34  ;;  %1861 = vmatpush.msrb.mxu1 %v1860_v30  ;;  %v3237_v20 = vpop.f32.mrf.mxu0 }
 0x15a   : > { %v3264_v61 = vpop.f32.mrf.mxu1 }
 0x15b   : > { %v1133_v33 = vpop.f32.mrf.mxu3  ;;  %v3173_v24 = vadd.f32 %v728_v58, %v615_v62 }
 0x15d   : > { %3752 = vst [vmem:[#allocation3_spill] sm:$0xff] %v3173_v24  ;;  %1447 = vmatmul.f32.vlgmr.msrb.gmra.mxu2 %v2995_v48 }
 0x160   : > { %1536 = vmatmul.f32.gmra.mxu3 %v3011_v27  ;;  %v972_v55 = vpop.f32.mrf.mxu2 }
 0x161   : > { %v973_v34 = vadd.f32 %v972_v55, %v3038_v37 }
 0x163   : > { %v1137_v17 = vpop.f32.mrf.mxu3  ;;  %v3181_v32 = vadd.f32 %v1133_v33, %v973_v34 }
 0x165   : > { %1451 = vmatmul.f32.gmra.mxu2 %v3011_v27 }
 0x168   : > { %1540 = vmatmul.f32.gmra.mxu3 %v3023_v50  ;;  %v980_v48 = vpop.f32.mrf.mxu2 }
 0x169   : > { %v981_v37 = vadd.f32 %v980_v48, %v3048_v28 }
 0x16b   : > { %v1141_v27 = vpop.f32.mrf.mxu3  ;;  %v3200_v22 = vadd.f32 %v1137_v17, %v981_v37  ;;  %v3252_v17 = vpop.f32.mrf.mxu0 }
 0x16d   : > { %1455 = vmatmul.f32.gmra.mxu2 %v3023_v50  ;;  %v1635_v50 = vld [vmem:[%s3744_s2 + $0x58] sm:$0xff] }
 0x16e   : > { %v3218_v40 = vand.u32 4294901760, %v1635_v50 }
 0x170   : > { %1544 = vmatmul.f32.gmra.mxu3 %v3031_v11  ;;  %v988_v28 = vpop.f32.mrf.mxu2  ;;  %1702 = vmatpush.msrb.mxu0 %v3218_v40 }
 0x171   : > { %v989_v59 = vadd.f32 %v988_v28, %v3058_v4  ;;  %v3225_v4 = vsub.f32 %v1635_v50, %v3218_v40  ;;  %2089 = vmatpush.msra.mxu3 %v3218_v40 }
 0x173   : > { %v1145_v54 = vpop.f32.mrf.mxu3  ;;  %v3210_v3 = vadd.f32 %v1141_v27, %v989_v59  ;;  %v3748_v21 = vand.u32 4294901760, %v3225_v4  ;;  %1979 = vmatpush.msra.mxu2 %v3225_v4 }
 0x175   : > { %1459 = vmatmul.f32.gmra.mxu2 %v3031_v11  ;;  %v1865_v47 = vsub.f32 %v3225_v4, %v3748_v21 }
 0x177   : > { %v1866_v62 = vand.u32 4294901760, %v1865_v47 }
 0x178   : > { %1548 = vmatmul.f32.gmra.mxu3 %v3041_v7  ;;  %v996_v8 = vpop.f32.mrf.mxu2 }
 0x179   : > { %v997_v11 = vadd.f32 %v996_v8, %v3068_v2  ;;  %1867 = vmatpush.msrb.mxu1 %v1866_v62 }
 0x17b   : > { %v1149_v10 = vpop.f32.mrf.mxu3  ;;  %v3231_v58 = vadd.f32 %v1145_v54, %v997_v11  ;;  %v3272_v54 = vpop.f32.mrf.mxu0  ;;  %v1633_v11 = vld [vmem:[%s3744_s2 + $0x48] sm:$0xff] }
 0x17d   : > { %1463 = vmatmul.f32.gmra.mxu2 %v3041_v7  ;;  %v1634_v7 = vld [vmem:[%s3744_s2 + $0x50] sm:$0xff] }
 0x17e   : > { %v3249_v34 = vand.u32 4294901760, %v1634_v7 }
 0x180   : > { %1552 = vmatmul.f32.gmra.mxu3 %v3051_v13  ;;  %v1004_v33 = vpop.f32.mrf.mxu2  ;;  %1704 = vmatpush.msrb.mxu0 %v3249_v34 }
 0x181   : > { %v1005_v2 = vadd.f32 %v1004_v33, %v3078_v25  ;;  %v3256_v25 = vsub.f32 %v1634_v7, %v3249_v34  ;;  %2091 = vmatpush.msra.mxu3 %v3249_v34 }
 0x183   : > { %v1153_v49 = vpop.f32.mrf.mxu3  ;;  %v3243_v55 = vadd.f32 %v1149_v10, %v1005_v2  ;;  %v3747_v37 = vand.u32 4294901760, %v3256_v25  ;;  %1982 = vmatpush.msra.mxu2 %v3256_v25  ;;  %v3280_v10 = vpop.f32.mrf.mxu1 }
 0x185   : > { %1467 = vmatmul.f32.gmra.mxu2 %v3051_v13  ;;  %v1871_v30 = vsub.f32 %v3256_v25, %v3747_v37 }
 0x187   : > { %v1872_v28 = vand.u32 4294901760, %v1871_v30  ;;  %v1632_v30 = vld [vmem:[%s3744_s2 + $0x40] sm:$0xff] }
 0x188   : > { %1556 = vmatmul.f32.gmra.mxu3 %v3061_v15  ;;  %v1012_v26 = vpop.f32.mrf.mxu2 }
 0x189   : > { %v1013_v13 = vadd.f32 %v1012_v26, %v3088_v0  ;;  %1873 = vmatpush.msrb.mxu1 %v1872_v28 }
 0x18b   : > { %v1157_v48 = vpop.f32.mrf.mxu3  ;;  %v3262_v27 = vadd.f32 %v1153_v49, %v1013_v13  ;;  %v3297_v49 = vpop.f32.mrf.mxu0 }
 0x18c   : > { %3753 = vst [vmem:[#allocation4_spill] sm:$0xff] %v3297_v49 }
 0x18d   : > { %1471 = vmatmul.f32.gmra.mxu2 %v3061_v15  ;;  %v3282_v15 = vand.u32 4294901760, %v1633_v11 }
 0x18f   : > { %1706 = vmatpush.msrb.mxu0 %v3282_v15  ;;  %2093 = vmatpush.msra.mxu3 %v3282_v15 }
 0x190   : > { %1560 = vmatmul.f32.gmra.mxu3 %v3071_v31  ;;  %v1020_v59 = vpop.f32.mrf.mxu2 }
 0x191   : > { %v1021_v0 = vadd.f32 %v1020_v59, %v3098_v1  ;;  %v3287_v1 = vsub.f32 %v1633_v11, %v3282_v15  ;;  %v3316_v59 = vand.u32 4294901760, %v1632_v30 }
 0x193   : > { %v1161_v50 = vpop.f32.mrf.mxu3  ;;  %v3274_v8 = vadd.f32 %v1157_v48, %v1021_v0  ;;  %v3746_v33 = vand.u32 4294901760, %v3287_v1  ;;  %1985 = vmatpush.msra.mxu2 %v3287_v1  ;;  %v3314_v28 = vpop.f32.mrf.mxu0  ;;  %1708 = vmatpush.msrb.mxu0 %v3316_v59  ;;  %v1881_v0 = vsub.f32 %v1632_v30, %v3316_v59 }
 0x194   : > { %3755 = vst [vmem:[#allocation6_spill] sm:$0xff] %v3314_v28  ;;  %2095 = vmatpush.msra.mxu3 %v3316_v59 }
 0x195   : > { %1475 = vmatmul.f32.gmra.mxu2 %v3071_v31  ;;  %v1877_v7 = vsub.f32 %v3287_v1, %v3746_v33  ;;  %v1882_v11 = vand.u32 4294901760, %v1881_v0 }
 0x196   : > { %1988 = vmatpush.msra.mxu2 %v1881_v0 }
 0x197   : > { %v1878_v26 = vand.u32 4294901760, %v1877_v7 }
 0x198   : > { %1564 = vmatmul.f32.gmra.mxu3 %v3081_v36  ;;  %v1028_v47 = vpop.f32.mrf.mxu2 }
 0x199   : > { %v1029_v31 = vadd.f32 %v1028_v47, %v3106_v6  ;;  %v3304_v6 = vpop.f32.mrf.mxu1  ;;  %1879 = vmatpush.msrb.mxu1 %v1878_v26  ;;  %v1883_v47 = vsub.f32 %v1881_v0, %v1882_v11  ;;  %v1631_v0 = vld [vmem:[%s3744_s2 + $0x38] sm:$0xff] }
 0x19a   : > { %3754 = vst [vmem:[#allocation5_spill] sm:$0xff] %v3304_v6  ;;  %v1709_v37 = vand.u32 4294901760, %v1631_v0 }
 0x19b   : > { %v3291_v62 = vpop.f32.mrf.mxu3  ;;  %v3295_v2 = vadd.f32 %v1161_v50, %v1029_v31  ;;  %v1884_v31 = vand.u32 4294901760, %v1883_v47  ;;  %v3330_v7 = vpop.f32.mrf.mxu0 }
 0x19c   : > { %3757 = vst [vmem:[#allocation8_spill] sm:$0xff] %v3330_v7  ;;  %1710 = vmatpush.msrb.mxu0 %v1709_v37  ;;  %v1887_v47 = vsub.f32 %v1631_v0, %v1709_v37  ;;  %2097 = vmatpush.msra.mxu3 %v1709_v37  ;;  %v1630_v0 = vld [vmem:[%s3744_s2 + $0x30] sm:$0xff] }
 0x19d   : > { %1479 = vmatmul.f32.gmra.mxu2 %v3081_v36  ;;  %1885 = vmatpush.msrb.mxu1 %v1884_v31  ;;  %v1711_v24 = vand.u32 4294901760, %v1630_v0 }
 0x19e   : > { %v1888_v5 = vand.u32 4294901760, %v1887_v47  ;;  %1991 = vmatpush.msra.mxu2 %v1887_v47 }
 0x19f   : > { %1712 = vmatpush.msrb.mxu0 %v1711_v24  ;;  %v1893_v28 = vsub.f32 %v1630_v0, %v1711_v24  ;;  %2099 = vmatpush.msra.mxu3 %v1711_v24  ;;  %v3763_v0 = vand.u32 4294901760, %v3225_v4 }
 0x1a0   : > { %1568 = vmatmul.f32.gmra.mxu3 %v3091_v60  ;;  %v3306_v13 = vpop.f32.mrf.mxu2  ;;  %v1889_v45 = vsub.f32 %v1887_v47, %v1888_v5 }
 0x1a1   : > { %v3324_v50 = vpop.f32.mrf.mxu1  ;;  %1994 = vmatpush.msra.mxu2 %v1893_v28 }
 0x1a2   : > { %3756 = vst [vmem:[#allocation7_spill] sm:$0xff] %v3324_v50 }
 0x1a3   : > { %v3308_v48 = vpop.f32.mrf.mxu3  ;;  %v1223_v21 = vpop.f32.mrf.mxu0 }
 0x1a5   : > { %1483 = vmatmul.f32.gmra.mxu2 %v3091_v60 }
 0x1a8   : > { %1572 = vmatmul.f32.gmra.mxu3 %v3101_v41  ;;  %v3319_v36 = vpop.f32.mrf.mxu2 }
 0x1a9   : > { %v3336_v33 = vpop.f32.mrf.mxu1 }
 0x1aa   : > { %3758 = vst [vmem:[#allocation9_spill] sm:$0xff] %v3336_v33  ;;  %v1890_v33 = vand.u32 4294901760, %v1889_v45  ;;  %v1894_v45 = vand.u32 4294901760, %v1893_v28 }
 0x1ab   : > { %v3326_v60 = vpop.f32.mrf.mxu3  ;;  %v1228_v47 = vpop.f32.mrf.mxu0 }
 0x1ac   : > { %1891 = vmatpush.msrb.mxu1 %v1890_v33  ;;  %v3762_v33 = vand.u32 4294901760, %v3192_v14  ;;  %v1895_v16 = vsub.f32 %v1893_v28, %v1894_v45 }
 0x1ad   : > { %1487 = vmatmul.f32.gmra.mxu2 %v3101_v41 }
 0x1b0   : > { %1576 = vmatmul.f32.gmra.mxu3 %v3110_v44  ;;  %v3332_v26 = vpop.f32.mrf.mxu2 }
 0x1b3   : > { %v3334_v30 = vpop.f32.mrf.mxu3  ;;  %v1233_v14 = vpop.f32.mrf.mxu0 }
 0x1b5   : > { %1491 = vmatmul.f32.gmra.mxu2 %v3110_v44  ;;  %v1325_v44 = vpop.f32.mrf.mxu1 }
 0x1b8   : > { %1580 = vmatmul.f32.gmra.mxu3 %v3119_v46  ;;  %v3343_v41 = vpop.f32.mrf.mxu2 }
 0x1bb   : > { %v3345_v31 = vpop.f32.mrf.mxu3 }
 0x1bc   : > { %3759 = vst [vmem:[#allocation10_spill] sm:$0xff] %v3345_v31 }
 0x1bd   : > { %1495 = vmatmul.f32.gmra.mxu2 %v3119_v46  ;;  %v3761_v46 = vand.u32 4294901760, %v3167_v23  ;;  %v1331_v6 = vpop.f32.mrf.mxu1  ;;  %v3764_v23 = vand.u32 4294901760, %v3256_v25 }
 0x1bf   : > { %2208 = vmatpush.msra.mxu0 %v3761_v46 }
 0x1c0   : > { %1584 = vmatmul.f32.gmra.mxu3 %v3128_v19  ;;  %v3349_v7 = vpop.f32.mrf.mxu2 }
 0x1c1   : > { %2212 = vmatpush.msra.mxu0 %v3762_v33 }
 0x1c3   : > { %v3354_v50 = vpop.f32.mrf.mxu3  ;;  %2216 = vmatpush.msra.mxu0 %v3763_v0 }
 0x1c4   : > { %3760 = vst [vmem:[#allocation11_spill] sm:$0xff] %v3354_v50  ;;  %v1896_v50 = vand.u32 4294901760, %v1895_v16 }
 0x1c5   : > { %1499 = vmatmul.f32.gmra.mxu2 %v3128_v19  ;;  %2220 = vmatpush.msra.mxu0 %v3764_v23  ;;  %v3765_v19 = vand.u32 4294901760, %v3287_v1  ;;  %v1337_v4 = vpop.f32.mrf.mxu1  ;;  %v1234_v23 = vadd.f32 %v1233_v14, %v3210_v3 }
 0x1c6   : > { %1897 = vmatpush.msrb.mxu1 %v1896_v50 }
 0x1c7   : > { %2224 = vmatpush.msra.mxu0 %v3765_v19 }
 0x1c8   : > { %1588 = vmatmul.f32.gmra.mxu3 %v3137_v63  ;;  %v3362_v31 = vpop.f32.mrf.mxu2  ;;  %2311 = vmatpush.msra.mxu1 %v3162_v38 }
 0x1c9   : > { %2228 = vmatpush.msra.mxu0 %v1882_v11 }
 0x1ca   : > { %2313 = vmatpush.msra.mxu1 %v3187_v35 }
 0x1cb   : > { %v3366_v49 = vpop.f32.mrf.mxu3  ;;  %2232 = vmatpush.msra.mxu0 %v1888_v5  ;;  %v1224_v5 = vadd.f32 %v1223_v21, %v3181_v32 }
 0x1cc   : > { %2315 = vmatpush.msra.mxu1 %v3218_v40 }
 0x1cd   : > { %1503 = vmatmul.f32.gmra.mxu2 %v3137_v63  ;;  %2236 = vmatpush.msra.mxu0 %v1894_v45  ;;  %v1238_v63 = vpop.f32.mrf.mxu0  ;;  %v1343_v40 = vpop.f32.mrf.mxu1  ;;  %v1326_v1 = vadd.f32 %v1325_v44, %v1224_v5 }
 0x1ce   : > { %2317 = vmatpush.msra.mxu1 %v3249_v34  ;;  %v3391_v34 = vld [vmem:[%s3744_s2 + $0x28] ss:$0 sm:$0xff] }
 0x1d0   : > { %1592 = vmatmul.f32.gmra.mxu3 %v3146_v57  ;;  %v3376_v16 = vpop.f32.mrf.mxu2  ;;  %2319 = vmatpush.msra.mxu1 %v3282_v15 }
 0x1d2   : > { %2321 = vmatpush.msra.mxu1 %v3316_v59  ;;  %v1229_v59 = vadd.f32 %v1228_v47, %v3200_v22 }
 0x1d3   : > { %v3379_v25 = vpop.f32.mrf.mxu3 }
 0x1d4   : > { %2323 = vmatpush.msra.mxu1 %v1709_v37 }
 0x1d5   : > { %1507 = vmatmul.f32.gmra.mxu2 %v3146_v57  ;;  %v1243_v57 = vpop.f32.mrf.mxu0  ;;  %v1349_v46 = vpop.f32.mrf.mxu1 }
 0x1d6   : > { %2325 = vmatpush.msra.mxu1 %v1711_v24  ;;  %v1332_v24 = vadd.f32 %v1331_v6, %v1229_v59  ;;  %v1338_v6 = vadd.f32 %v1337_v4, %v1234_v23 }
 0x1d8   : > { %v3385_v38 = vpop.f32.mrf.mxu2 }
 0x1db   : > { %v1533_v35 = vpop.f32.mrf.mxu3 }
 0x1dd   : > { %v1248_v5 = vpop.f32.mrf.mxu0 }
 0x1e0   : > { %v1448_v28 = vpop.f32.mrf.mxu2 }
 0x1e1   : > { %v1449_v50 = vadd.f32 %v1448_v28, %v1326_v1  ;;  %v1355_v28 = vpop.f32.mrf.mxu1 }
 0x1e3   : > { %v1537_v15 = vpop.f32.mrf.mxu3  ;;  %v1534_v11 = vadd.f32 %v1533_v35, %v1449_v50 }
 0x1e5   : > { %v1598_v37 = vadd.f32 %v3391_v34, %v1534_v11 }
 0x1e7   : > { %v1614_v32 = vmax.f32 %v1598_v37, 0.0 }
 0x1e8   : > { %v1452_v21 = vpop.f32.mrf.mxu2 }
 0x1e9   : > { %v1642_v44 = vsel %vm1640_vm3, %v1614_v32, 0  ;;  %v1453_v45 = vadd.f32 %v1452_v21, %v1332_v24  ;;  %v1239_v24 = vadd.f32 %v1238_v63, %v3231_v58  ;;  %v1361_v58 = vpop.f32.mrf.mxu1 }
 0x1ea   : > { %v3396_v33 = vand.u32 4294901760, %v1642_v44 }
 0x1eb   : > { %v1541_v0 = vpop.f32.mrf.mxu3  ;;  %v1538_v19 = vadd.f32 %v1537_v15, %v1453_v45  ;;  %v1344_v23 = vadd.f32 %v1343_v40, %v1239_v24 }
 0x1ec   : > { %v1714_v22 = vsub.f32 %v1642_v44, %v3396_v33  ;;  %1899 = vmatmul.f32.vlgmr.msrb.gmra.mxu1 %v3396_v33  ;;  %v1253_v44 = vpop.f32.mrf.mxu0 }
 0x1ed   : > { %v1599_v47 = vadd.f32 %v3391_v34, %v1538_v19 }
 0x1ee   : > { %v1715_v35 = vand.u32 4294901760, %v1714_v22  ;;  %1997 = vmatmul.f32.vlgmr.msra.gmra.mxu2 %v1714_v22 }
 0x1ef   : > { %v1615_v1 = vmax.f32 %v1599_v47, 0.0 }
 0x1f0   : > { %v1716_v50 = vsub.f32 %v1714_v22, %v1715_v35  ;;  %v1456_v59 = vpop.f32.mrf.mxu2  ;;  %2103 = vmatmul.f32.vlgmr.msra.gmra.mxu3 %v1715_v35 }
 0x1f1   : > { %v1645_v11 = vsel %vm1640_vm3, %v1615_v1, 0  ;;  %v1457_v37 = vadd.f32 %v1456_v59, %v1338_v6 }
 0x1f2   : > { %v3403_v3 = vand.u32 4294901760, %v1645_v11  ;;  %v1717_v14 = vand.u32 4294901760, %v1716_v50  ;;  %v1244_v50 = vadd.f32 %v1243_v57, %v3243_v55 }
 0x1f3   : > { %v1545_v15 = vpop.f32.mrf.mxu3  ;;  %v1542_v32 = vadd.f32 %v1541_v0, %v1457_v37 }
 0x1f4   : > { %1718 = vmatmul.f32.vlgmr.msrb.gmra.mxu0 %v1717_v14  ;;  %1903 = vmatmul.f32.gmra.mxu1 %v3403_v3  ;;  %v1722_v4 = vsub.f32 %v1645_v11, %v3403_v3  ;;  %v1350_v14 = vadd.f32 %v1349_v46, %v1244_v50 }
 0x1f5   : > { %v1600_v21 = vadd.f32 %v3391_v34, %v1542_v32  ;;  %v1258_v32 = vpop.f32.mrf.mxu0 }
 0x1f6   : > { %2002 = vmatmul.f32.gmra.mxu2 %v1722_v4  ;;  %v1723_v45 = vand.u32 4294901760, %v1722_v4 }
 0x1f7   : > { %v1616_v19 = vmax.f32 %v1600_v21, 0.0 }
 0x1f8   : > { %v1460_v22 = vpop.f32.mrf.mxu2  ;;  %2109 = vmatmul.f32.gmra.mxu3 %v1723_v45  ;;  %v1724_v47 = vsub.f32 %v1722_v4, %v1723_v45 }
 0x1f9   : > { %v1648_v35 = vsel %vm1640_vm3, %v1616_v19, 0  ;;  %v1461_v6 = vadd.f32 %v1460_v22, %v1344_v23  ;;  %v1249_v19 = vadd.f32 %v1248_v5, %v3262_v27 }
 0x1fa   : > { %v3410_v63 = vand.u32 4294901760, %v1648_v35  ;;  %v1725_v0 = vand.u32 4294901760, %v1724_v47  ;;  %v1367_v47 = vpop.f32.mrf.mxu1 }
 0x1fb   : > { %v1549_v1 = vpop.f32.mrf.mxu3  ;;  %v1546_v59 = vadd.f32 %v1545_v15, %v1461_v6 }
 0x1fc   : > { %1726 = vmatmul.f32.gmra.mxu0 %v1725_v0  ;;  %1907 = vmatmul.f32.gmra.mxu1 %v3410_v63  ;;  %v1730_v40 = vsub.f32 %v1648_v35, %v3410_v63  ;;  %v1356_v0 = vadd.f32 %v1355_v28, %v1249_v19 }
 0x1fd   : > { %v1601_v11 = vadd.f32 %v3391_v34, %v1546_v59  ;;  %v1263_v27 = vpop.f32.mrf.mxu0 }
 0x1fe   : > { %2007 = vmatmul.f32.gmra.mxu2 %v1730_v40  ;;  %v1731_v37 = vand.u32 4294901760, %v1730_v40 }
 0x1ff   : > { %v1617_v24 = vmax.f32 %v1601_v11, 0.0 }
 0x200   : > { %v1464_v4 = vpop.f32.mrf.mxu2  ;;  %2115 = vmatmul.f32.gmra.mxu3 %v1731_v37  ;;  %v1732_v21 = vsub.f32 %v1730_v40, %v1731_v37 }
 0x201   : > { %v1651_v45 = vsel %vm1640_vm3, %v1617_v24, 0  ;;  %v1465_v23 = vadd.f32 %v1464_v4, %v1350_v14  ;;  %v1254_v24 = vadd.f32 %v1253_v44, %v3274_v8 }
 0x202   : > { %v3417_v55 = vand.u32 4294901760, %v1651_v45  ;;  %v1733_v57 = vand.u32 4294901760, %v1732_v21  ;;  %v785_v21 = vadd.f32 %v3196_v39, %v3112_v29  ;;  %v1259_v29 = vadd.f32 %v1258_v32, %v3295_v2 }
 0x203   : > { %v1553_v15 = vpop.f32.mrf.mxu3  ;;  %v1550_v22 = vadd.f32 %v1549_v1, %v1465_v23  ;;  %v1373_v23 = vpop.f32.mrf.mxu1  ;;  %v1362_v19 = vadd.f32 %v1361_v58, %v1254_v24 }
 0x204   : > { %1734 = vmatmul.f32.gmra.mxu0 %v1733_v57  ;;  %1911 = vmatmul.f32.gmra.mxu1 %v3417_v55  ;;  %v1738_v46 = vsub.f32 %v1651_v45, %v3417_v55  ;;  %v867_v8 = vadd.f32 %v3206_v18, %v785_v21  ;;  %v789_v18 = vadd.f32 %v3212_v53, %v3121_v9 }
 0x205   : > { %v1602_v35 = vadd.f32 %v3391_v34, %v1550_v22 }
 0x206   : > { %2012 = vmatmul.f32.gmra.mxu2 %v1738_v46  ;;  %v1739_v6 = vand.u32 4294901760, %v1738_v46  ;;  %v1037_v39 = vadd.f32 %v3306_v13, %v867_v8 }
 0x207   : > { %v1618_v50 = vmax.f32 %v1602_v35, 0.0 }
 0x208   : > { %v1468_v59 = vpop.f32.mrf.mxu2  ;;  %2121 = vmatmul.f32.gmra.mxu3 %v1739_v6  ;;  %v1740_v40 = vsub.f32 %v1738_v46, %v1739_v6  ;;  %v1166_v24 = vadd.f32 %v3291_v62, %v1037_v39 }
 0x209   : > { %v1654_v11 = vsel %vm1640_vm3, %v1618_v50, 0  ;;  %v1469_v37 = vadd.f32 %v1468_v59, %v1356_v0 }
 0x20a   : > { %v3424_v5 = vand.u32 4294901760, %v1654_v11  ;;  %v1741_v1 = vand.u32 4294901760, %v1740_v40  ;;  %v1268_v40 = vpop.f32.mrf.mxu0 }
 0x20b   : > { %v1557_v14 = vpop.f32.mrf.mxu3  ;;  %v1554_v4 = vadd.f32 %v1553_v15, %v1469_v37  ;;  %v1379_v32 = vpop.f32.mrf.mxu1 }
 0x20c   : > { %1742 = vmatmul.f32.gmra.mxu0 %v1741_v1  ;;  %1915 = vmatmul.f32.gmra.mxu1 %v3424_v5  ;;  %v1746_v28 = vsub.f32 %v1654_v11, %v3424_v5  ;;  %v1368_v1 = vadd.f32 %v1367_v47, %v1259_v29 }
 0x20d   : > { %v1603_v45 = vadd.f32 %v3391_v34, %v1554_v4  ;;  %v871_v4 = vadd.f32 %v3221_v56, %v789_v18 }
 0x20e   : > { %2017 = vmatmul.f32.gmra.mxu2 %v1746_v28  ;;  %v1747_v57 = vand.u32 4294901760, %v1746_v28 }
 0x20f   : > { %v1619_v22 = vmax.f32 %v1603_v45, 0.0 }
 0x210   : > { %v1472_v46 = vpop.f32.mrf.mxu2  ;;  %2127 = vmatmul.f32.gmra.mxu3 %v1747_v57  ;;  %v1748_v35 = vsub.f32 %v1746_v28, %v1747_v57  ;;  %v1264_v57 = vadd.f32 %v1263_v27, %v1166_v24 }
 0x211   : > { %v1657_v44 = vsel %vm1640_vm3, %v1619_v22, 0  ;;  %v1473_v15 = vadd.f32 %v1472_v46, %v1362_v19  ;;  %v1045_v19 = vadd.f32 %v3319_v36, %v871_v4  ;;  %v793_v22 = vadd.f32 %v3237_v20, %v3130_v52 }
 0x212   : > { %v3434_v6 = vand.u32 4294901760, %v1657_v44  ;;  %v1749_v0 = vand.u32 4294901760, %v1748_v35  ;;  %v1273_v46 = vpop.f32.mrf.mxu0  ;;  %v1374_v8 = vadd.f32 %v1373_v23, %v1264_v57 }
 0x213   : > { %v1561_v50 = vpop.f32.mrf.mxu3  ;;  %v1558_v59 = vadd.f32 %v1557_v14, %v1473_v15  ;;  %v1385_v39 = vpop.f32.mrf.mxu1 }
 0x214   : > { %1750 = vmatmul.f32.gmra.mxu0 %v1749_v0  ;;  %1919 = vmatmul.f32.gmra.mxu1 %v3434_v6  ;;  %v1754_v58 = vsub.f32 %v1657_v44, %v3434_v6  ;;  %v1170_v44 = vadd.f32 %v3308_v48, %v1045_v19  ;;  %v875_v0 = vadd.f32 %v3241_v43, %v793_v22 }
 0x215   : > { %v1604_v11 = vadd.f32 %v3391_v34, %v1558_v59  ;;  %v797_v43 = vadd.f32 %v3252_v17, %v3139_v12 }
 0x216   : > { %2022 = vmatmul.f32.gmra.mxu2 %v1754_v58  ;;  %v1755_v37 = vand.u32 4294901760, %v1754_v58  ;;  %v1053_v18 = vadd.f32 %v3332_v26, %v875_v0 }
 0x217   : > { %v1620_v2 = vmax.f32 %v1604_v11, 0.0 }
 0x218   : > { %v1476_v13 = vpop.f32.mrf.mxu2  ;;  %2133 = vmatmul.f32.gmra.mxu3 %v1755_v37  ;;  %v1756_v14 = vsub.f32 %v1754_v58, %v1755_v37  ;;  %v1269_v58 = vadd.f32 %v1268_v40, %v1170_v44  ;;  %v1174_v24 = vadd.f32 %v3326_v60, %v1053_v18  ;;  %v3767_v18 = vld [vmem:[#allocation10_spill] sm:$0xff] }
 0x219   : > { %v1660_v28 = vsel %vm1640_vm3, %v1620_v2, 0  ;;  %v1477_v21 = vadd.f32 %v1476_v13, %v1368_v1 }
 0x21a   : > { %v3446_v45 = vand.u32 4294901760, %v1660_v28  ;;  %v1757_v9 = vand.u32 4294901760, %v1756_v14  ;;  %v1380_v1 = vadd.f32 %v1379_v32, %v1269_v58  ;;  %v1278_v40 = vpop.f32.mrf.mxu0  ;;  %v879_v14 = vadd.f32 %v3264_v61, %v797_v43 }
 0x21b   : > { %v1565_v53 = vpop.f32.mrf.mxu3  ;;  %v1562_v47 = vadd.f32 %v1561_v50, %v1477_v21  ;;  %v1391_v57 = vpop.f32.mrf.mxu1  ;;  %v801_v61 = vadd.f32 %v3272_v54, %v3148_v42 }
 0x21c   : > { %1758 = vmatmul.f32.gmra.mxu0 %v1757_v9  ;;  %1923 = vmatmul.f32.gmra.mxu1 %v3446_v45  ;;  %v1762_v62 = vsub.f32 %v1660_v28, %v3446_v45  ;;  %v1274_v9 = vadd.f32 %v1273_v46, %v1174_v24 }
 0x21d   : > { %v1605_v56 = vadd.f32 %v3391_v34, %v1562_v47 }
 0x21e   : > { %2027 = vmatmul.f32.gmra.mxu2 %v1762_v62  ;;  %v1763_v35 = vand.u32 4294901760, %v1762_v62 }
 0x21f   : > { %v1621_v27 = vmax.f32 %v1605_v56, 0.0 }
 0x220   : > { %v1480_v15 = vpop.f32.mrf.mxu2  ;;  %2139 = vmatmul.f32.gmra.mxu3 %v1763_v35  ;;  %v1764_v36 = vsub.f32 %v1762_v62, %v1763_v35  ;;  %v1386_v62 = vadd.f32 %v1385_v39, %v1274_v9  ;;  %v883_v35 = vadd.f32 %v3280_v10, %v801_v61 }
 0x221   : > { %v1663_v50 = vsel %vm1640_vm3, %v1621_v27, 0  ;;  %v1481_v29 = vadd.f32 %v1480_v15, %v1374_v8 }
 0x222   : > { %v3457_v59 = vand.u32 4294901760, %v1663_v50  ;;  %v1765_v52 = vand.u32 4294901760, %v1764_v36  ;;  %v1283_v27 = vpop.f32.mrf.mxu0  ;;  %v1069_v0 = vadd.f32 %v3349_v7, %v883_v35 }
 0x223   : > { %v1569_v20 = vpop.f32.mrf.mxu3  ;;  %v1566_v23 = vadd.f32 %v1565_v53, %v1481_v29  ;;  %v1061_v53 = vadd.f32 %v3343_v41, %v879_v14  ;;  %v3766_v29 = vld [vmem:[#allocation4_spill] sm:$0xff] }
 0x224   : > { %1766 = vmatmul.f32.gmra.mxu0 %v1765_v52  ;;  %1927 = vmatmul.f32.gmra.mxu1 %v3457_v59  ;;  %v1770_v48 = vsub.f32 %v1663_v50, %v3457_v59  ;;  %v805_v10 = vadd.f32 %v3766_v29, %v3153_v51  ;;  %v1397_v52 = vpop.f32.mrf.mxu1 }
 0x225   : > { %v1606_v11 = vadd.f32 %v3391_v34, %v1566_v23  ;;  %v1178_v22 = vadd.f32 %v3334_v30, %v1061_v53  ;;  %v1182_v23 = vadd.f32 %v3767_v18, %v1069_v0  ;;  %v3773_v0 = vld [vmem:[#allocation3_spill] sm:$0xff] }
 0x226   : > { %2032 = vmatmul.f32.gmra.mxu2 %v1770_v48  ;;  %v1771_v37 = vand.u32 4294901760, %v1770_v48 }
 0x227   : > { %v1622_v2 = vmax.f32 %v1606_v11, 0.0  ;;  %v1279_v36 = vadd.f32 %v1278_v40, %v1178_v22  ;;  %v3768_v11 = vld [vmem:[#allocation5_spill] sm:$0xff]  ;;  %v3772_v22 = vld [vmem:[#allocation7_spill] sm:$0xff] }
 0x228   : > { %v1484_v13 = vpop.f32.mrf.mxu2  ;;  %2145 = vmatmul.f32.gmra.mxu3 %v1771_v37  ;;  %v1772_v26 = vsub.f32 %v1770_v48, %v1771_v37  ;;  %v887_v37 = vadd.f32 %v3768_v11, %v805_v10 }
 0x229   : > { %v1666_v4 = vsel %vm1640_vm3, %v1622_v2, 0  ;;  %v1485_v28 = vadd.f32 %v1484_v13, %v1380_v1  ;;  %v1392_v58 = vadd.f32 %v1391_v57, %v1279_v36  ;;  %v1284_v13 = vadd.f32 %v1283_v27, %v1182_v23  ;;  %v3775_v23 = vld [vmem:[#allocation9_spill] sm:$0xff] }
 0x22a   : > { %v3468_v21 = vand.u32 4294901760, %v1666_v4  ;;  %v1773_v12 = vand.u32 4294901760, %v1772_v26  ;;  %v1077_v26 = vadd.f32 %v3362_v31, %v887_v37 }
 0x22b   : > { %v1573_v17 = vpop.f32.mrf.mxu3  ;;  %v1570_v32 = vadd.f32 %v1569_v20, %v1485_v28  ;;  %v1398_v57 = vadd.f32 %v1397_v52, %v1284_v13 }
 0x22c   : > { %1774 = vmatmul.f32.gmra.mxu0 %v1773_v12  ;;  %1931 = vmatmul.f32.gmra.mxu1 %v3468_v21  ;;  %v1778_v60 = vsub.f32 %v1666_v4, %v3468_v21  ;;  %v1288_v4 = vpop.f32.mrf.mxu0  ;;  %v3769_v12 = vld [vmem:[#allocation2_spill] sm:$0xff] }
 0x22d   : > { %v1607_v19 = vadd.f32 %v3391_v34, %v1570_v32 }
 0x22e   : > { %2037 = vmatmul.f32.gmra.mxu2 %v1778_v60  ;;  %v1779_v47 = vand.u32 4294901760, %v1778_v60 }
 0x22f   : > { %v1623_v56 = vmax.f32 %v1607_v19, 0.0 }
 0x230   : > { %v1488_v46 = vpop.f32.mrf.mxu2  ;;  %2151 = vmatmul.f32.gmra.mxu3 %v1779_v47  ;;  %v1780_v41 = vsub.f32 %v1778_v60, %v1779_v47  ;;  %v3771_v60 = vld [vmem:[#allocation11_spill] sm:$0xff]  ;;  %v1403_v47 = vpop.f32.mrf.mxu1 }
 0x231   : > { %v1669_v8 = vsel %vm1640_vm3, %v1623_v56, 0  ;;  %v1489_v44 = vadd.f32 %v1488_v46, %v1386_v62  ;;  %v1186_v61 = vadd.f32 %v3771_v60, %v1077_v26 }
 0x232   : > { %v3479_v15 = vand.u32 4294901760, %v1669_v8  ;;  %v1781_v42 = vand.u32 4294901760, %v1780_v41 }
 0x233   : > { %v1577_v54 = vpop.f32.mrf.mxu3  ;;  %v1574_v50 = vadd.f32 %v1573_v17, %v1489_v44  ;;  %v3770_v17 = vld [vmem:[#allocation6_spill] sm:$0xff]  ;;  %v1289_v44 = vadd.f32 %v1288_v4, %v1186_v61 }
 0x234   : > { %1782 = vmatmul.f32.gmra.mxu0 %v1781_v42  ;;  %1935 = vmatmul.f32.gmra.mxu1 %v3479_v15  ;;  %v1786_v30 = vsub.f32 %v1669_v8, %v3479_v15  ;;  %v809_v9 = vadd.f32 %v3770_v17, %v3769_v12  ;;  %v1293_v10 = vpop.f32.mrf.mxu0 }
 0x235   : > { %v1608_v39 = vadd.f32 %v3391_v34, %v1574_v50  ;;  %v3774_v50 = vld [vmem:[#allocation8_spill] sm:$0xff]  ;;  %v1404_v52 = vadd.f32 %v1403_v47, %v1289_v44 }
 0x236   : > { %2042 = vmatmul.f32.gmra.mxu2 %v1786_v30  ;;  %v1787_v20 = vand.u32 4294901760, %v1786_v30  ;;  %v891_v56 = vadd.f32 %v3772_v22, %v809_v9 }
 0x237   : > { %v1624_v48 = vmax.f32 %v1608_v39, 0.0 }
 0x238   : > { %v1492_v43 = vpop.f32.mrf.mxu2  ;;  %2157 = vmatmul.f32.gmra.mxu3 %v1787_v20  ;;  %v1788_v7 = vsub.f32 %v1786_v30, %v1787_v20  ;;  %v1085_v27 = vadd.f32 %v3376_v16, %v891_v56  ;;  %v813_v30 = vadd.f32 %v3774_v50, %v3773_v0  ;;  %v1409_v11 = vpop.f32.mrf.mxu1 }
 0x239   : > { %v1672_v1 = vsel %vm1640_vm3, %v1624_v48, 0  ;;  %v1493_v24 = vadd.f32 %v1492_v43, %v1392_v58 }
 0x23a   : > { %v3490_v2 = vand.u32 4294901760, %v1672_v1  ;;  %v1789_v51 = vand.u32 4294901760, %v1788_v7  ;;  %v1190_v20 = vadd.f32 %v3366_v49, %v1085_v27  ;;  %v895_v48 = vadd.f32 %v3775_v23, %v813_v30 }
 0x23b   : > { %v1581_v40 = vpop.f32.mrf.mxu3  ;;  %v1578_v14 = vadd.f32 %v1577_v54, %v1493_v24 }
 0x23c   : > { %1790 = vmatmul.f32.gmra.mxu0 %v1789_v51  ;;  %1939 = vmatmul.f32.gmra.mxu1 %v3490_v2  ;;  %v1794_v28 = vsub.f32 %v1672_v1, %v3490_v2  ;;  %v1294_v24 = vadd.f32 %v1293_v10, %v1190_v20  ;;  %v1093_v51 = vadd.f32 %v3385_v38, %v895_v48  ;;  %v1298_v17 = vpop.f32.mrf.mxu0 }
 0x23d   : > { %v1609_v53 = vadd.f32 %v3391_v34, %v1578_v14 }
 0x23e   : > { %2047 = vmatmul.f32.gmra.mxu2 %v1794_v28  ;;  %v1795_v32 = vand.u32 4294901760, %v1794_v28  ;;  %v1410_v4 = vadd.f32 %v1409_v11, %v1294_v24 }
 0x23f   : > { %v1625_v19 = vmax.f32 %v1609_v53, 0.0 }
 0x240   : > { %v1496_v31 = vpop.f32.mrf.mxu2  ;;  %2163 = vmatmul.f32.gmra.mxu3 %v1795_v32  ;;  %v1796_v62 = vsub.f32 %v1794_v28, %v1795_v32  ;;  %v1194_v28 = vadd.f32 %v3379_v25, %v1093_v51  ;;  %v1415_v47 = vpop.f32.mrf.mxu1 }
 0x241   : > { %v1675_v46 = vsel %vm1640_vm3, %v1625_v19, 0  ;;  %v1497_v41 = vadd.f32 %v1496_v31, %v1398_v57 }
 0x242   : > { %v3501_v35 = vand.u32 4294901760, %v1675_v46  ;;  %v1797_v8 = vand.u32 4294901760, %v1796_v62  ;;  %v1299_v61 = vadd.f32 %v1298_v17, %v1194_v28 }
 0x243   : > { %v1582_v42 = vadd.f32 %v1581_v40, %v1497_v41  ;;  %v1585_v36 = vpop.f32.mrf.mxu3 }
 0x244   : > { %1798 = vmatmul.f32.gmra.mxu0 %v1797_v8  ;;  %1943 = vmatmul.f32.gmra.mxu1 %v3501_v35  ;;  %v1802_v54 = vsub.f32 %v1675_v46, %v3501_v35  ;;  %v1416_v22 = vadd.f32 %v1415_v47, %v1299_v61 }
 0x245   : > { %v1610_v29 = vadd.f32 %v3391_v34, %v1582_v42 }
 0x246   : > { %2052 = vmatmul.f32.gmra.mxu2 %v1802_v54  ;;  %v1803_v39 = vand.u32 4294901760, %v1802_v54 }
 0x247   : > { %v1626_v58 = vmax.f32 %v1610_v29, 0.0 }
 0x248   : > { %v1500_v16 = vpop.f32.mrf.mxu2  ;;  %2169 = vmatmul.f32.gmra.mxu3 %v1803_v39  ;;  %v1804_v18 = vsub.f32 %v1802_v54, %v1803_v39 }
 0x249   : > { %v1678_v43 = vsel %vm1640_vm3, %v1626_v58, 0  ;;  %v1501_v7 = vadd.f32 %v1500_v16, %v1404_v52 }
 0x24a   : > { %v3512_v37 = vand.u32 4294901760, %v1678_v43  ;;  %v1805_v1 = vand.u32 4294901760, %v1804_v18 }
 0x24b   : > { %v1586_v40 = vadd.f32 %v1585_v36, %v1501_v7  ;;  %v1589_v14 = vpop.f32.mrf.mxu3 }
 0x24c   : > { %1806 = vmatmul.f32.gmra.mxu0 %v1805_v1  ;;  %1947 = vmatmul.f32.gmra.mxu1 %v3512_v37  ;;  %v1810_v49 = vsub.f32 %v1678_v43, %v3512_v37 }
 0x24d   : > { %v1611_v13 = vadd.f32 %v3391_v34, %v1586_v40 }
 0x24e   : > { %2057 = vmatmul.f32.gmra.mxu2 %v1810_v49  ;;  %v1811_v26 = vand.u32 4294901760, %v1810_v49 }
 0x24f   : > { %v1627_v12 = vmax.f32 %v1611_v13, 0.0 }
 0x250   : > { %v1504_v9 = vpop.f32.mrf.mxu2  ;;  %2175 = vmatmul.f32.gmra.mxu3 %v1811_v26  ;;  %v1812_v53 = vsub.f32 %v1810_v49, %v1811_v26 }
 0x251   : > { %v1681_v38 = vsel %vm1640_vm3, %v1627_v12, 0  ;;  %v1505_v32 = vadd.f32 %v1504_v9, %v1410_v4 }
 0x252   : > { %v3520_v57 = vand.u32 4294901760, %v1681_v38  ;;  %v1813_v60 = vand.u32 4294901760, %v1812_v53 }
 0x253   : > { %v1590_v19 = vadd.f32 %v1589_v14, %v1505_v32  ;;  %v1593_v41 = vpop.f32.mrf.mxu3 }
 0x254   : > { %1814 = vmatmul.f32.gmra.mxu0 %v1813_v60  ;;  %1951 = vmatmul.f32.gmra.mxu1 %v3520_v57  ;;  %v1818_v31 = vsub.f32 %v1681_v38, %v3520_v57 }
 0x255   : > { %v1612_v25 = vadd.f32 %v3391_v34, %v1590_v19 }
 0x256   : > { %2062 = vmatmul.f32.gmra.mxu2 %v1818_v31  ;;  %v1819_v62 = vand.u32 4294901760, %v1818_v31 }
 0x257   : > { %v1628_v56 = vmax.f32 %v1612_v25, 0.0 }
 0x258   : > { %v1508_v46 = vpop.f32.mrf.mxu2  ;;  %2181 = vmatmul.f32.gmra.mxu3 %v1819_v62  ;;  %v1820_v8 = vsub.f32 %v1818_v31, %v1819_v62 }
 0x259   : > { %v1684_v44 = vsel %vm1640_vm3, %v1628_v56, 0  ;;  %v1509_v27 = vadd.f32 %v1508_v46, %v1416_v22 }
 0x25a   : > { %v3526_v42 = vand.u32 4294901760, %v1684_v44  ;;  %v1821_v54 = vand.u32 4294901760, %v1820_v8 }
 0x25b   : > { %v1594_v36 = vadd.f32 %v1593_v41, %v1509_v27 }
 0x25c   : > { %1822 = vmatmul.f32.gmra.mxu0 %v1821_v54  ;;  %1955 = vmatmul.f32.gmra.mxu1 %v3526_v42  ;;  %v1826_v0 = vsub.f32 %v1684_v44, %v3526_v42 }
 0x25d   : > { %v1613_v50 = vadd.f32 %v3391_v34, %v1594_v36 }
 0x25e   : > { %2067 = vmatmul.f32.gmra.mxu2 %v1826_v0  ;;  %v1827_v30 = vand.u32 4294901760, %v1826_v0 }
 0x25f   : > { %v1629_v29 = vmax.f32 %v1613_v50, 0.0 }
 0x260   : > { %2187 = vmatmul.f32.gmra.mxu3 %v1827_v30  ;;  %v1828_v10 = vsub.f32 %v1826_v0, %v1827_v30 }
 0x261   : > { %v1687_v39 = vsel %vm1640_vm3, %v1629_v29, 0 }
 0x262   : > { %v3532_v52 = vand.u32 4294901760, %v1687_v39  ;;  %v1829_v20 = vand.u32 4294901760, %v1828_v10 }
 0x264   : > { %1830 = vmatmul.f32.gmra.mxu0 %v1829_v20  ;;  %1959 = vmatmul.f32.gmra.mxu1 %v3532_v52  ;;  %v1834_v58 = vsub.f32 %v1687_v39, %v3532_v52 }
 0x266   : > { %2072 = vmatmul.f32.gmra.mxu2 %v1834_v58  ;;  %v1835_v16 = vand.u32 4294901760, %v1834_v58 }
 0x268   : > { %2193 = vmatmul.f32.gmra.mxu3 %v1835_v16  ;;  %v1836_v18 = vsub.f32 %v1834_v58, %v1835_v16 }
 0x269   : > { %v3536_v34 = vpop.f32.mrf.mxu1 }
 0x26a   : > { %v1837_v23 = vand.u32 4294901760, %v1836_v18 }
 0x26c   : > { %1838 = vmatmul.f32.gmra.mxu0 %v1837_v23  ;;  %2327 = vmatmul.f32.vlgmr.msra.gmra.mxu1 %v3396_v33 }
 0x271   : > { %v3539_v48 = vpop.f32.mrf.mxu0  ;;  %v3541_v43 = vpop.f32.mrf.mxu1 }
 0x272   : > { %v1998_v47 = vpop.f32.mrf.mxu2 }
 0x274   : > { %2238 = vmatmul.f32.vlgmr.msra.gmra.mxu0 %v3396_v33  ;;  %2331 = vmatmul.f32.gmra.mxu1 %v3403_v3 }
 0x279   : > { %v3545_v7 = vpop.f32.mrf.mxu0  ;;  %v3547_v11 = vpop.f32.mrf.mxu1 }
 0x27c   : > { %2242 = vmatmul.f32.gmra.mxu0 %v3403_v3  ;;  %2335 = vmatmul.f32.gmra.mxu1 %v3410_v63 }
 0x281   : > { %v3551_v1 = vpop.f32.mrf.mxu0  ;;  %v3553_v24 = vpop.f32.mrf.mxu1 }
 0x284   : > { %2246 = vmatmul.f32.gmra.mxu0 %v3410_v63  ;;  %2339 = vmatmul.f32.gmra.mxu1 %v3417_v55 }
 0x289   : > { %v3557_v51 = vpop.f32.mrf.mxu0  ;;  %v3559_v33 = vpop.f32.mrf.mxu1 }
 0x28c   : > { %2250 = vmatmul.f32.gmra.mxu0 %v3417_v55  ;;  %2343 = vmatmul.f32.gmra.mxu1 %v3424_v5 }
 0x291   : > { %v3563_v40 = vpop.f32.mrf.mxu0  ;;  %v3565_v3 = vpop.f32.mrf.mxu1 }
 0x294   : > { %2254 = vmatmul.f32.gmra.mxu0 %v3424_v5  ;;  %2347 = vmatmul.f32.gmra.mxu1 %v3434_v6 }
 0x299   : > { %v3569_v49 = vpop.f32.mrf.mxu0  ;;  %v3571_v63 = vpop.f32.mrf.mxu1 }
 0x29c   : > { %2258 = vmatmul.f32.gmra.mxu0 %v3434_v6  ;;  %2351 = vmatmul.f32.gmra.mxu1 %v3446_v45  ;;  %v3588_v6 = vld [vmem:[%s3744_s2 + $0x70] ss:$0 sm:$0xff] }
 0x29d   : > { %v1728_v16 = vadd.f32 %v3588_v6, %v3545_v7  ;;  %v3640_v7 = vld [vmem:[%s3744_s2 + $0x78] ss:$0 sm:$0xff] }
 0x2a1   : > { %v3575_v13 = vpop.f32.mrf.mxu0  ;;  %v3577_v55 = vpop.f32.mrf.mxu1 }
 0x2a4   : > { %2262 = vmatmul.f32.gmra.mxu0 %v3446_v45  ;;  %2355 = vmatmul.f32.gmra.mxu1 %v3457_v59 }
 0x2a9   : > { %v3581_v26 = vpop.f32.mrf.mxu0  ;;  %v1932_v5 = vpop.f32.mrf.mxu1 }
 0x2ac   : > { %2266 = vmatmul.f32.gmra.mxu0 %v3457_v59  ;;  %2359 = vmatmul.f32.gmra.mxu1 %v3468_v21 }
 0x2b1   : > { %v1783_v14 = vpop.f32.mrf.mxu0  ;;  %v1936_v4 = vpop.f32.mrf.mxu1 }
 0x2b2   : > { %v1784_v28 = vadd.f32 %v3588_v6, %v1783_v14 }
 0x2b4   : > { %v3591_v12 = vadd.f32 %v1932_v5, %v1784_v28  ;;  %2270 = vmatmul.f32.gmra.mxu0 %v3468_v21  ;;  %2363 = vmatmul.f32.gmra.mxu1 %v3479_v15  ;;  %v1736_v28 = vadd.f32 %v3588_v6, %v3551_v1 }
 0x2b9   : > { %v1791_v45 = vpop.f32.mrf.mxu0  ;;  %v1940_v17 = vpop.f32.mrf.mxu1 }
 0x2ba   : > { %v1792_v59 = vadd.f32 %v3588_v6, %v1791_v45 }
 0x2bc   : > { %v3596_v9 = vadd.f32 %v1936_v4, %v1792_v59  ;;  %2274 = vmatmul.f32.gmra.mxu0 %v3479_v15  ;;  %2367 = vmatmul.f32.gmra.mxu1 %v3490_v2  ;;  %v2104_v15 = vpop.f32.mrf.mxu3 }
 0x2c1   : > { %v1799_v53 = vpop.f32.mrf.mxu0  ;;  %v1944_v38 = vpop.f32.mrf.mxu1 }
 0x2c2   : > { %v1800_v32 = vadd.f32 %v3588_v6, %v1799_v53  ;;  %v1909_v53 = vadd.f32 %v3547_v11, %v1736_v28 }
 0x2c4   : > { %v3601_v60 = vadd.f32 %v1940_v17, %v1800_v32  ;;  %2278 = vmatmul.f32.gmra.mxu0 %v3490_v2  ;;  %2371 = vmatmul.f32.gmra.mxu1 %v3501_v35  ;;  %v2003_v2 = vpop.f32.mrf.mxu2  ;;  %v2110_v8 = vpop.f32.mrf.mxu3 }
 0x2c9   : > { %v1807_v21 = vpop.f32.mrf.mxu0  ;;  %v1948_v61 = vpop.f32.mrf.mxu1 }
 0x2ca   : > { %v1808_v19 = vadd.f32 %v3588_v6, %v1807_v21 }
 0x2cc   : > { %v3606_v31 = vadd.f32 %v1944_v38, %v1808_v19  ;;  %2282 = vmatmul.f32.gmra.mxu0 %v3501_v35  ;;  %2375 = vmatmul.f32.gmra.mxu1 %v3512_v37  ;;  %v2008_v27 = vpop.f32.mrf.mxu2  ;;  %v2116_v50 = vpop.f32.mrf.mxu3 }
 0x2cd   : > { %v2009_v1 = vadd.f32 %v2008_v27, %v1909_v53  ;;  %v1752_v27 = vadd.f32 %v3588_v6, %v3563_v40 }
 0x2d1   : > { %v1815_v25 = vpop.f32.mrf.mxu0  ;;  %v1952_v62 = vpop.f32.mrf.mxu1 }
 0x2d2   : > { %v1816_v22 = vadd.f32 %v3588_v6, %v1815_v25 }
 0x2d4   : > { %v3611_v56 = vadd.f32 %v1948_v61, %v1816_v22  ;;  %2286 = vmatmul.f32.gmra.mxu0 %v3512_v37  ;;  %2379 = vmatmul.f32.gmra.mxu1 %v3520_v57  ;;  %v1720_v37 = vadd.f32 %v3588_v6, %v3539_v48  ;;  %v2013_v39 = vpop.f32.mrf.mxu2  ;;  %v2122_v23 = vpop.f32.mrf.mxu3  ;;  %v2117_v22 = vadd.f32 %v2116_v50, %v2009_v1 }
 0x2d5   : > { %v1917_v50 = vadd.f32 %v3559_v33, %v1752_v27 }
 0x2d6   : > { %v1901_v29 = vadd.f32 %v3536_v34, %v1720_v37 }
 0x2d8   : > { %v1999_v58 = vadd.f32 %v1998_v47, %v1901_v29  ;;  %v1744_v47 = vadd.f32 %v3588_v6, %v3557_v51 }
 0x2d9   : > { %v1823_v46 = vpop.f32.mrf.mxu0  ;;  %v1956_v41 = vpop.f32.mrf.mxu1 }
 0x2da   : > { %v1824_v44 = vadd.f32 %v3588_v6, %v1823_v46  ;;  %v2105_v48 = vadd.f32 %v2104_v15, %v1999_v58 }
 0x2dc   : > { %v3616_v35 = vadd.f32 %v1952_v62, %v1824_v44  ;;  %2290 = vmatmul.f32.gmra.mxu0 %v3520_v57  ;;  %2383 = vmatmul.f32.gmra.mxu1 %v3526_v42  ;;  %v2018_v45 = vpop.f32.mrf.mxu2  ;;  %v2128_v38 = vpop.f32.mrf.mxu3 }
 0x2e1   : > { %v1831_v54 = vpop.f32.mrf.mxu0  ;;  %v1960_v36 = vpop.f32.mrf.mxu1 }
 0x2e2   : > { %v1832_v0 = vadd.f32 %v3588_v6, %v1831_v54 }
 0x2e4   : > { %v3623_v30 = vadd.f32 %v1956_v41, %v1832_v0  ;;  %2294 = vmatmul.f32.gmra.mxu0 %v3526_v42  ;;  %2387 = vmatmul.f32.gmra.mxu1 %v3532_v52  ;;  %v1905_v42 = vadd.f32 %v3541_v43, %v1728_v16  ;;  %v2023_v25 = vpop.f32.mrf.mxu2  ;;  %v2019_v16 = vadd.f32 %v2018_v45, %v1917_v50 }
 0x2e5   : > { %v1768_v45 = vadd.f32 %v3588_v6, %v3575_v13 }
 0x2e6   : > { %v2004_v4 = vadd.f32 %v2003_v2, %v1905_v42  ;;  %v1913_v2 = vadd.f32 %v3553_v24, %v1744_v47  ;;  %v1776_v47 = vadd.f32 %v3588_v6, %v3581_v26 }
 0x2e9   : > { %v1839_v57 = vpop.f32.mrf.mxu0  ;;  %v2328_v10 = vpop.f32.mrf.mxu1 }
 0x2ea   : > { %v1840_v20 = vadd.f32 %v3588_v6, %v1839_v57 }
 0x2ec   : > { %v3631_v18 = vadd.f32 %v1960_v36, %v1840_v20  ;;  %2298 = vmatmul.f32.gmra.mxu0 %v3532_v52  ;;  %v2111_v52 = vadd.f32 %v2110_v8, %v2004_v4  ;;  %v2134_v8 = vpop.f32.mrf.mxu3  ;;  %v2014_v36 = vadd.f32 %v2013_v39, %v1913_v2  ;;  %v2028_v29 = vpop.f32.mrf.mxu2  ;;  %v1760_v39 = vadd.f32 %v3588_v6, %v3569_v49 }
 0x2ee   : > { %v2123_v37 = vadd.f32 %v2122_v23, %v2014_v36  ;;  %v1921_v23 = vadd.f32 %v3565_v3, %v1760_v39 }
 0x2f1   : > { %v2239_v5 = vpop.f32.mrf.mxu0  ;;  %v2332_v14 = vpop.f32.mrf.mxu1 }
 0x2f2   : > { %v2240_v34 = vadd.f32 %v2239_v5, %v2105_v48  ;;  %v2129_v5 = vadd.f32 %v2128_v38, %v2019_v16  ;;  %v1925_v38 = vadd.f32 %v3571_v63, %v1768_v45 }
 0x2f4   : > { %v2329_v17 = vadd.f32 %v2328_v10, %v2240_v34  ;;  %v2140_v48 = vpop.f32.mrf.mxu3  ;;  %v2033_v4 = vpop.f32.mrf.mxu2  ;;  %v2029_v1 = vadd.f32 %v2028_v29, %v1925_v38 }
 0x2f6   : > { %v2391_v59 = vmax.f32 %v2329_v17, 0.0 }
 0x2f8   : > { %v2410_v43 = vmul.f32 %v3640_v7, %v2391_v59  ;;  %v2024_v59 = vadd.f32 %v2023_v25, %v1921_v23 }
 0x2f9   : > { %v2243_v32 = vpop.f32.mrf.mxu0  ;;  %v2336_v21 = vpop.f32.mrf.mxu1 }
 0x2fa   : > { %v2244_v61 = vadd.f32 %v2243_v32, %v2111_v52  ;;  %v2426_v19 = vsel %vm897_vm2, %v2410_v43, 0.0  ;;  %v2135_v43 = vadd.f32 %v2134_v8, %v2024_v59 }
 0x2fb   : > { %2427 = vadd.xlane.f32.xlu0 %v2426_v19 }
 0x2fc   : > { %v2333_v15 = vadd.f32 %v2332_v14, %v2244_v61  ;;  %v2146_v52 = vpop.f32.mrf.mxu3 }
 0x2fe   : > { %v2392_v62 = vmax.f32 %v2333_v15, 0.0  ;;  %v2038_v15 = vpop.f32.mrf.mxu2 }
 0x2ff   : > { %v2039_v29 = vadd.f32 %v2038_v15, %v3591_v12 }
 0x300   : > { %v2411_v11 = vmul.f32 %v3640_v7, %v2392_v62  ;;  %v2141_v62 = vadd.f32 %v2140_v48, %v2029_v1 }
 0x301   : > { %v2247_v46 = vpop.f32.mrf.mxu0  ;;  %v2340_v41 = vpop.f32.mrf.mxu1 }
 0x302   : > { %v2248_v44 = vadd.f32 %v2247_v46, %v2117_v22  ;;  %v2429_v54 = vsel %vm897_vm2, %v2411_v11, 0.0  ;;  %v1929_v22 = vadd.f32 %v3577_v55, %v1776_v47 }
 0x303   : > { %2430 = vadd.xlane.f32.xlu0 %v2429_v54 }
 0x304   : > { %v2337_v51 = vadd.f32 %v2336_v21, %v2248_v44  ;;  %v2152_v2 = vpop.f32.mrf.mxu3  ;;  %v2034_v44 = vadd.f32 %v2033_v4, %v1929_v22 }
 0x306   : > { %v2393_v0 = vmax.f32 %v2337_v51, 0.0  ;;  %v2043_v36 = vpop.f32.mrf.mxu2  ;;  %v2147_v26 = vadd.f32 %v2146_v52, %v2034_v44 }
 0x308   : > { %v2412_v24 = vmul.f32 %v3640_v7, %v2393_v0 }
 0x309   : > { %v2251_v57 = vpop.f32.mrf.mxu0  ;;  %v2344_v10 = vpop.f32.mrf.mxu1 }
 0x30a   : > { %v2252_v20 = vadd.f32 %v2251_v57, %v2123_v37  ;;  %v2432_v58 = vsel %vm897_vm2, %v2412_v24, 0.0 }
 0x30b   : > { %2433 = vadd.xlane.f32.xlu1 %v2432_v58 }
 0x30c   : > { %v2341_v40 = vadd.f32 %v2340_v41, %v2252_v20  ;;  %v2158_v50 = vpop.f32.mrf.mxu3 }
 0x30e   : > { %v2394_v42 = vmax.f32 %v2341_v40, 0.0  ;;  %v2048_v20 = vpop.f32.mrf.mxu2 }
 0x30f   : > { %v2049_v45 = vadd.f32 %v2048_v20, %v3601_v60 }
 0x310   : > { %v2413_v33 = vmul.f32 %v3640_v7, %v2394_v42  ;;  %v2044_v42 = vadd.f32 %v2043_v36, %v3596_v9 }
 0x311   : > { %v2255_v14 = vpop.f32.mrf.mxu0  ;;  %v2348_v34 = vpop.f32.mrf.mxu1 }
 0x312   : > { %v2256_v28 = vadd.f32 %v2255_v14, %v2129_v5  ;;  %v2435_v17 = vsel %vm897_vm2, %v2413_v33, 0.0  ;;  %v2159_v14 = vadd.f32 %v2158_v50, %v2044_v42 }
 0x313   : > { %2436 = vadd.xlane.f32.xlu1 %v2435_v17 }
 0x314   : > { %v2345_v49 = vadd.f32 %v2344_v10, %v2256_v28  ;;  %v2153_v10 = vadd.f32 %v2152_v2, %v2039_v29  ;;  %v2164_v23 = vpop.f32.mrf.mxu3 }
 0x316   : > { %v2395_v53 = vmax.f32 %v2345_v49, 0.0  ;;  %v2053_v59 = vpop.f32.mrf.mxu2 }
 0x318   : > { %v2414_v3 = vmul.f32 %v3640_v7, %v2395_v53 }
 0x319   : > { %v2259_v32 = vpop.f32.mrf.mxu0  ;;  %v2352_v21 = vpop.f32.mrf.mxu1 }
 0x31a   : > { %v2260_v61 = vadd.f32 %v2259_v32, %v2135_v43  ;;  %v2438_v19 = vsel %vm897_vm2, %v2414_v3, 0.0  ;;  %v2165_v43 = vadd.f32 %v2164_v23, %v2049_v45  ;;  %v2602_v45 = vld [vmem:[%s3744_s2 + $0x80] ss:$0 sm:$0xff] }
 0x31b   : > { %2439 = vadd.xlane.f32.xlu2 %v2438_v19 }
 0x31c   : > { %v2349_v13 = vadd.f32 %v2348_v34, %v2260_v61  ;;  %v2170_v53 = vpop.f32.mrf.mxu3  ;;  %v2054_v61 = vadd.f32 %v2053_v59, %v3606_v31 }
 0x31e   : > { %v2396_v25 = vmax.f32 %v2349_v13, 0.0  ;;  %v2058_v1 = vpop.f32.mrf.mxu2  ;;  %v2171_v15 = vadd.f32 %v2170_v53, %v2054_v61 }
 0x31f   : > { %v2059_v2 = vadd.f32 %v2058_v1, %v3611_v56 }
 0x320   : > { %v2415_v63 = vmul.f32 %v3640_v7, %v2396_v25 }
 0x321   : > { %v2263_v11 = vpop.f32.mrf.mxu0  ;;  %v2356_v46 = vpop.f32.mrf.mxu1 }
 0x322   : > { %v2264_v41 = vadd.f32 %v2263_v11, %v2141_v62  ;;  %v2441_v8 = vsel %vm897_vm2, %v2415_v63, 0.0 }
 0x323   : > { %2442 = vadd.xlane.f32.xlu2 %v2441_v8 }
 0x324   : > { %v2353_v54 = vadd.f32 %v2352_v21, %v2264_v41  ;;  %v2176_v13 = vpop.f32.mrf.mxu3 }
 0x325   : > { %v2177_v8 = vadd.f32 %v2176_v13, %v2059_v2 }
 0x326   : > { %v2397_v27 = vmax.f32 %v2353_v54, 0.0  ;;  %v2063_v41 = vpop.f32.mrf.mxu2 }
 0x328   : > { %v2416_v6 = vmul.f32 %v3640_v7, %v2397_v27 }
 0x329   : > { %v2267_v51 = vpop.f32.mrf.mxu0  ;;  %v2360_v0 = vpop.f32.mrf.mxu1 }
 0x32a   : > { %v2268_v37 = vadd.f32 %v2267_v51, %v2147_v26  ;;  %v2444_v55 = vsel %vm897_vm2, %v2416_v6, 0.0  ;;  %v2064_v26 = vadd.f32 %v2063_v41, %v3616_v35 }
 0x32b   : > { %2445 = vadd.xlane.f32.xlu0 %v2444_v55 }
 0x32c   : > { %v2357_v24 = vadd.f32 %v2356_v46, %v2268_v37  ;;  %v2182_v27 = vpop.f32.mrf.mxu3 }
 0x32d   : > { %v2183_v37 = vadd.f32 %v2182_v27, %v2064_v26 }
 0x32e   : > { %v2398_v57 = vmax.f32 %v2357_v24, 0.0  ;;  %v2068_v55 = vpop.f32.mrf.mxu2 }
 0x330   : > { %v2417_v58 = vmul.f32 %v3640_v7, %v2398_v57  ;;  %v2069_v57 = vadd.f32 %v2068_v55, %v3623_v30 }
 0x331   : > { %v2271_v16 = vpop.f32.mrf.mxu0  ;;  %v2364_v39 = vpop.f32.mrf.mxu1 }
 0x332   : > { %v2272_v48 = vadd.f32 %v2271_v16, %v2153_v10  ;;  %v2447_v40 = vsel %vm897_vm2, %v2417_v58, 0.0 }
 0x333   : > { %2448 = vadd.xlane.f32.xlu1 %v2447_v40 }
 0x334   : > { %v2361_v5 = vadd.f32 %v2360_v0, %v2272_v48  ;;  %v2188_v20 = vpop.f32.mrf.mxu3 }
 0x335   : > { %v2189_v16 = vadd.f32 %v2188_v20, %v2069_v57 }
 0x336   : > { %v2399_v33 = vmax.f32 %v2361_v5, 0.0  ;;  %v2073_v5 = vpop.f32.mrf.mxu2 }
 0x337   : > { %v2074_v23 = vadd.f32 %v2073_v5, %v3631_v18 }
 0x338   : > { %v2418_v12 = vmul.f32 %v3640_v7, %v2399_v33 }
 0x339   : > { %v2275_v34 = vpop.f32.mrf.mxu0  ;;  %v2368_v4 = vpop.f32.mrf.mxu1 }
 0x33a   : > { %v2276_v28 = vadd.f32 %v2275_v34, %v2159_v14  ;;  %v2450_v17 = vsel %vm897_vm2, %v2418_v12, 0.0 }
 0x33b   : > { %2451 = vadd.xlane.f32.xlu2 %v2450_v17 }
 0x33c   : > { %v2365_v49 = vadd.f32 %v2364_v39, %v2276_v28  ;;  %v2194_v12 = vpop.f32.mrf.mxu3 }
 0x33d   : > { %v2195_v30 = vadd.f32 %v2194_v12, %v2074_v23 }
 0x33e   : > { %v2400_v52 = vmax.f32 %v2365_v49, 0.0 }
 0x340   : > { %v2419_v9 = vmul.f32 %v3640_v7, %v2400_v52 }
 0x341   : > { %v2279_v38 = vpop.f32.mrf.mxu0  ;;  %v2372_v21 = vpop.f32.mrf.mxu1 }
 0x342   : > { %v2280_v3 = vadd.f32 %v2279_v38, %v2165_v43  ;;  %v2453_v32 = vsel %vm897_vm2, %v2419_v9, 0.0 }
 0x343   : > { %2454 = vadd.xlane.f32.xlu0 %v2453_v32 }
 0x344   : > { %v2369_v19 = vadd.f32 %v2368_v4, %v2280_v3 }
 0x346   : > { %v2401_v47 = vmax.f32 %v2369_v19, 0.0 }
 0x348   : > { %v2420_v60 = vmul.f32 %v3640_v7, %v2401_v47 }
 0x349   : > { %v2283_v25 = vpop.f32.mrf.mxu0  ;;  %v2376_v11 = vpop.f32.mrf.mxu1 }
 0x34a   : > { %v2284_v62 = vadd.f32 %v2283_v25, %v2171_v15  ;;  %v2456_v22 = vsel %vm897_vm2, %v2420_v60, 0.0 }
 0x34b   : > { %2457 = vadd.xlane.f32.xlu1 %v2456_v22 }
 0x34c   : > { %v2373_v63 = vadd.f32 %v2372_v21, %v2284_v62 }
 0x34e   : > { %v2402_v46 = vmax.f32 %v2373_v63, 0.0 }
 0x350   : > { %v2421_v31 = vmul.f32 %v3640_v7, %v2402_v46 }
 0x351   : > { %v2287_v44 = vpop.f32.mrf.mxu0  ;;  %v2380_v0 = vpop.f32.mrf.mxu1 }
 0x352   : > { %v2288_v54 = vadd.f32 %v2287_v44, %v2177_v8  ;;  %v2459_v36 = vsel %vm897_vm2, %v2421_v31, 0.0 }
 0x353   : > { %2460 = vadd.xlane.f32.xlu2 %v2459_v36 }
 0x354   : > { %v2377_v6 = vadd.f32 %v2376_v11, %v2288_v54 }
 0x356   : > { %v2403_v51 = vmax.f32 %v2377_v6, 0.0 }
 0x358   : > { %v2422_v56 = vmul.f32 %v3640_v7, %v2403_v51 }
 0x359   : > { %v2291_v50 = vpop.f32.mrf.mxu0  ;;  %v2384_v39 = vpop.f32.mrf.mxu1 }
 0x35a   : > { %v2292_v29 = vadd.f32 %v2291_v50, %v2183_v37  ;;  %v2462_v24 = vsel %vm897_vm2, %v2422_v56, 0.0 }
 0x35b   : > { %2463 = vadd.xlane.f32.xlu0 %v2462_v24 }
 0x35c   : > { %v2381_v10 = vadd.f32 %v2380_v0, %v2292_v29 }
 0x35e   : > { %v2404_v58 = vmax.f32 %v2381_v10, 0.0 }
 0x360   : > { %v2423_v35 = vmul.f32 %v3640_v7, %v2404_v58 }
 0x361   : > { %v2295_v48 = vpop.f32.mrf.mxu0  ;;  %v2388_v59 = vpop.f32.mrf.mxu1 }
 0x362   : > { %v2296_v40 = vadd.f32 %v2295_v48, %v2189_v16  ;;  %v2465_v42 = vsel %vm897_vm2, %v2423_v35, 0.0 }
 0x363   : > { %2466 = vadd.xlane.f32.xlu1 %v2465_v42 }
 0x364   : > { %v2385_v33 = vadd.f32 %v2384_v39, %v2296_v40 }
 0x366   : > { %v2405_v14 = vmax.f32 %v2385_v33, 0.0 }
 0x368   : > { %v2424_v34 = vmul.f32 %v3640_v7, %v2405_v14 }
 0x369   : > { %v2299_v4 = vpop.f32.mrf.mxu0 }
 0x36a   : > { %v2300_v28 = vadd.f32 %v2299_v4, %v2195_v30  ;;  %v2468_v17 = vsel %vm897_vm2, %v2424_v34, 0.0 }
 0x36b   : > { %2469 = vadd.xlane.f32.xlu2 %v2468_v17 }
 0x36c   : > { %v2389_v49 = vadd.f32 %v2388_v59, %v2300_v28 }
 0x36e   : > { %v2406_v52 = vmax.f32 %v2389_v49, 0.0  ;;  %v2428_v18 = vpop.xlane.xlu0 %2427 }
 0x36f   : > { %v2475_v53 = vadd.f32 %v2602_v45, %v2428_v18 }
 0x370   : > { %v2425_v43 = vmul.f32 %v3640_v7, %v2406_v52 }
 0x371   : > { %2492 = vst.msk [vmem:[%s3703_s6] sm:$0xff] %vm2491_vm4, %v2475_v53 }
 0x372   : > { %v2471_v9 = vsel %vm897_vm2, %v2425_v43, 0.0 }
 0x373   : > { %2472 = vadd.xlane.f32.xlu0 %v2471_v9 }
 0x376   : > { %v2431_v38 = vpop.xlane.xlu0 %2430 }
 0x377   : > { %v2476_v3 = vadd.f32 %v2602_v45, %v2431_v38 }
 0x379   : > { %2493 = vst.msk [vmem:[%s3703_s6 + $0x8] sm:$0xff] %vm2491_vm4, %v2476_v3 }
 0x37e   : > { %v2434_v32 = vpop.xlane.xlu1 %2433 }
 0x37f   : > { %v2477_v21 = vadd.f32 %v2602_v45, %v2434_v32 }
 0x381   : > { %2494 = vst.msk [vmem:[%s3703_s6 + $0x10] sm:$0xff] %vm2491_vm4, %v2477_v21 }
 0x386   : > { %v2437_v61 = vpop.xlane.xlu1 %2436 }
 0x387   : > { %v2478_v19 = vadd.f32 %v2602_v45, %v2437_v61 }
 0x389   : > { %2495 = vst.msk [vmem:[%s3703_s6 + $0x18] sm:$0xff] %vm2491_vm4, %v2478_v19 }
 0x38e   : > { %v2440_v7 = vpop.xlane.xlu2 %2439 }
 0x38f   : > { %v2479_v1 = vadd.f32 %v2602_v45, %v2440_v7 }
 0x391   : > { %2496 = vst.msk [vmem:[%s3703_s6 + $0x20] sm:$0xff] %vm2491_vm4, %v2479_v1 }
 0x396   : > { %v2443_v47 = vpop.xlane.xlu2 %2442 }
 0x397   : > { %v2480_v15 = vadd.f32 %v2602_v45, %v2443_v47 }
 0x399   : > { %2497 = vst.msk [vmem:[%s3703_s6 + $0x28] sm:$0xff] %vm2491_vm4, %v2480_v15 }
 0x39e   : > { %v2446_v60 = vpop.xlane.xlu0 %2445 }
 0x39f   : > { %v2481_v13 = vadd.f32 %v2602_v45, %v2446_v60 }
 0x3a1   : > { %2498 = vst.msk [vmem:[%s3703_s6 + $0x30] sm:$0xff] %vm2491_vm4, %v2481_v13 }
 0x3a6   : > { %v2449_v25 = vpop.xlane.xlu1 %2448 }
 0x3a7   : > { %v2482_v62 = vadd.f32 %v2602_v45, %v2449_v25 }
 0x3a9   : > { %2499 = vst.msk [vmem:[%s3703_s6 + $0x38] sm:$0xff] %vm2491_vm4, %v2482_v62 }
 0x3ae   : > { %v2452_v22 = vpop.xlane.xlu2 %2451 }
 0x3af   : > { %v2483_v2 = vadd.f32 %v2602_v45, %v2452_v22 }
 0x3b1   : > { %2500 = vst.msk [vmem:[%s3703_s6 + $0x40] sm:$0xff] %vm2491_vm4, %v2483_v2 }
 0x3b6   : > { %v2455_v63 = vpop.xlane.xlu0 %2454 }
 0x3b7   : > { %v2484_v11 = vadd.f32 %v2602_v45, %v2455_v63 }
 0x3b9   : > { %2501 = vst.msk [vmem:[%s3703_s6 + $0x48] sm:$0xff] %vm2491_vm4, %v2484_v11 }
 0x3be   : > { %v2458_v46 = vpop.xlane.xlu1 %2457 }
 0x3bf   : > { %v2485_v41 = vadd.f32 %v2602_v45, %v2458_v46 }
 0x3c1   : > { %2502 = vst.msk [vmem:[%s3703_s6 + $0x50] sm:$0xff] %vm2491_vm4, %v2485_v41 }
 0x3c6   : > { %v2461_v8 = vpop.xlane.xlu2 %2460 }
 0x3c7   : > { %v2486_v31 = vadd.f32 %v2602_v45, %v2461_v8 }
 0x3c9   : > { %2503 = vst.msk [vmem:[%s3703_s6 + $0x58] sm:$0xff] %vm2491_vm4, %v2486_v31 }
 0x3ce   : > { %v2464_v44 = vpop.xlane.xlu0 %2463 }
 0x3cf   : > { %v2487_v54 = vadd.f32 %v2602_v45, %v2464_v44 }
 0x3d1   : > { %2504 = vst.msk [vmem:[%s3703_s6 + $0x60] sm:$0xff] %vm2491_vm4, %v2487_v54 }
 0x3d6   : > { %v2467_v36 = vpop.xlane.xlu1 %2466 }
 0x3d7   : > { %v2488_v27 = vadd.f32 %v2602_v45, %v2467_v36 }
 0x3d9   : > { %2505 = vst.msk [vmem:[%s3703_s6 + $0x68] sm:$0xff] %vm2491_vm4, %v2488_v27 }
 0x3de   : > { %v2470_v26 = vpop.xlane.xlu2 %2469 }
 0x3df   : > { %v2489_v6 = vadd.f32 %v2602_v45, %v2470_v26 }
 0x3e1   : > { %2506 = vst.msk [vmem:[%s3703_s6 + $0x70] sm:$0xff] %vm2491_vm4, %v2489_v6 }
 0x3e6   : > { %v2473_v51 = vpop.xlane.xlu0 %2472 }
 0x3e7   : > { %v2490_v0 = vadd.f32 %v2602_v45, %v2473_v51 }
 0x3e9   : > { %2507 = vst.msk [vmem:[%s3703_s6 + $0x78] sm:$0xff] %vm2491_vm4, %v2490_v0 }
 0x3ea PF: > { %s13_s12 = sadd.s32 1, %s2609_s12  }
 0x3eb   : > { %p10_p4 = scmp.ge.s32.totalorder %s13_s12, 4  }
 0x3ed   :  { %12 = sbr.rel (!%p10_p4) target bundleno = 1 (0x1), region = 65 }

</bundles_post_ra>
